<compile_context>
chip_gen: v6e
topology: v6e:2x2x1
jax: 0.10.0
libtpu: 0.0.40
codegen_flags: <defaults>
</compile_context>

<pallas_src>
import jax
import jax.numpy as jnp
from jax.experimental import pallas as pl
from jax.experimental.pallas import tpu as pltpu

BN_EPS = 1e-5
KH = KW = 3


def _conv_bn_add_kernel(w_ref, shift_ref, xp_ref, o_ref):
    # w_ref:     SMEM (Cout*Cin*KH*KW,) f32 - conv weights with BN scale folded in,
    #            flattened in (co, ci, dy, dx) order.
    # shift_ref: SMEM (Cout,) f32           - folded BN shift (+ conv bias * scale).
    # xp_ref:    VMEM (Cin, H+2, W+2) f32   - one zero-padded image (halo = 1).
    # o_ref:     VMEM (Cout, H, W) f32      - bn(conv(x)) + relu(x) for that image.
    cout, H, W = o_ref.shape
    cin = xp_ref.shape[0]

    accs = [jnp.zeros((H, W), jnp.float32) for _ in range(cout)]
    for ci in range(cin):
        xc = xp_ref[ci]                          # (H+2, W+2), loaded once per channel
        for dy in range(KH):
            for dx in range(KW):
                win = xc[dy:dy + H, dx:dx + W]   # shifted window (static slice)
                for co in range(cout):
                    idx = ((co * cin + ci) * KH + dy) * KW + dx
                    accs[co] = accs[co] + win * w_ref[idx]

    for co in range(cout):
        # relu(x) residual: the interior of the zero-padded tile is exactly x.
        resid = jnp.maximum(xp_ref[co, 1:1 + H, 1:1 + W], 0.0)
        o_ref[co] = (accs[co] + shift_ref[co] + resid).astype(o_ref.dtype)


def conv2d_add_forward(x_nchw, conv_w, gamma, beta, run_mean, run_var, conv_b=None):
    """Forward of Conv2dAddModule: bn(conv(x)) + relu(x).

    BatchNorm is implemented in inference mode (running stats folded into the
    conv weights / a per-channel shift).
    # TODO(synk): training-mode BN (batch statistics + running-stat update) not implemented.
    """
    N, Cin, H, W = x_nchw.shape
    Cout = conv_w.shape[0]
    assert conv_w.shape == (Cout, Cin, KH, KW)
    assert Cin == Cout, "residual add requires in_channels == out_channels"

    x = x_nchw.astype(jnp.float32)
    # Zero-pad H/W by 1 (conv halo). Stays NCHW end to end - no transposes.
    xp = jnp.pad(x, ((0, 0), (0, 0), (1, 1), (1, 1)))
    Hp, Wp = H + 2, W + 2

    # Fold BatchNorm (eval mode): scale into the weights, shift as a bias.
    scale = gamma / jnp.sqrt(run_var + BN_EPS)
    shift = beta - run_mean * scale
    if conv_b is not None:
        shift = shift + conv_b * scale
    w_folded = (conv_w.astype(jnp.float32) * scale[:, None, None, None]).reshape(-1)

    # TODO(synk): for very large images (padded image > a few MiB per channel set),
    # additionally tile H with a halo via manual DMA; one image per step is fine
    # at typical sizes and keeps the double-buffered footprint tiny on v7x (64 MiB VMEM).
    out = pl.pallas_call(
        _conv_bn_add_kernel,
        out_shape=jax.ShapeDtypeStruct((N, Cout, H, W), jnp.float32),
        grid=(N,),
        in_specs=[
            pl.BlockSpec(memory_space=pltpu.MemorySpace.SMEM),           # folded weights
            pl.BlockSpec(memory_space=pltpu.MemorySpace.SMEM),           # folded shift
            pl.BlockSpec((None, Cin, Hp, Wp), lambda n: (n, 0, 0, 0)),   # padded image n
        ],
        out_specs=pl.BlockSpec((None, Cout, H, W), lambda n: (n, 0, 0, 0)),
        compiler_params=pltpu.CompilerParams(
            dimension_semantics=("parallel",)),
    )(w_folded, shift.astype(jnp.float32), xp)
    return out


def _reference(x_nchw, conv_w, gamma, beta, run_mean, run_var):
    conv = jax.lax.conv_general_dilated(
        x_nchw, conv_w, window_strides=(1, 1), padding=((1, 1), (1, 1)),
        dimension_numbers=("NCHW", "OIHW", "NCHW"))
    c = lambda v: v.reshape(1, -1, 1, 1)
    bn = (conv - c(run_mean)) / jnp.sqrt(c(run_var) + BN_EPS) * c(gamma) + c(beta)
    return bn + jnp.maximum(x_nchw, 0.0)


if __name__ == "__main__":
    key = jax.random.PRNGKey(0)
    k_x, k_w, k_g, k_b, k_m, k_v = jax.random.split(key, 6)

    N, C, H, W = 2, 3, 16, 16  # in_channels = out_channels = 3 per the module
    x = jax.random.normal(k_x, (N, C, H, W), dtype=jnp.float32)

    # Conv2d(3, 3, kernel_size=3, bias=False): weight (Cout, Cin, KH, KW),
    # PyTorch-style uniform(-1/sqrt(fan_in), 1/sqrt(fan_in)) init.
    fan_in = C * KH * KW
    bound = 1.0 / jnp.sqrt(jnp.float32(fan_in))
    conv_w = jax.random.uniform(k_w, (C, C, KH, KW), jnp.float32, -bound, bound)

    # BatchNorm2d(3) parameters / running stats (deterministic, nontrivial).
    gamma = 1.0 + 0.1 * jax.random.normal(k_g, (C,), jnp.float32)
    beta = 0.1 * jax.random.normal(k_b, (C,), jnp.float32)
    run_mean = 0.2 * jax.random.normal(k_m, (C,), jnp.float32)
    run_var = jax.random.uniform(k_v, (C,), jnp.float32, 0.5, 1.5)

    out = conv2d_add_forward(x, conv_w, gamma, beta, run_mean, run_var)
    out = jax.block_until_ready(out)

    ref = jax.block_until_ready(_reference(x, conv_w, gamma, beta, run_mean, run_var))
    assert out.shape == (N, C, H, W)
    assert jnp.allclose(out, ref, rtol=1e-4, atol=1e-4), float(jnp.max(jnp.abs(out - ref)))

    print("KERNEL_OK")
</pallas_src>

<mosaic_0001>
module attributes {stable_mosaic.version = 11 : i64} {
  func.func @_conv_bn_add_kernel(%arg0: i32, %arg1: memref<81xf32, #tpu.memory_space<smem>>, %arg2: memref<3xf32, #tpu.memory_space<smem>>, %arg3: memref<1x3x18x18xf32, #tpu.memory_space<vmem>>, %arg4: memref<1x3x16x16xf32, #tpu.memory_space<vmem>>) attributes {dimension_semantics = [#tpu.dimension_semantics<parallel>], iteration_bounds = array<i64: 2>, scalar_prefetch = 0 : i64, scratch_operands = 0 : i64, tpu.core_type = #tpu.core_type<tc>, window_params = [{transform_indices = @transform_0, window_bounds = array<i64: 81>}, {transform_indices = @transform_1, window_bounds = array<i64: 3>}, {transform_indices = @transform_2, window_bounds = array<i64: 1, 3, 18, 18>}, {transform_indices = @transform_3, window_bounds = array<i64: 1, 3, 16, 16>}]} {
    %cst = arith.constant 0.000000e+00 : f32
    %0 = vector.broadcast %cst : f32 to vector<16x16xf32>
    %cst_0 = arith.constant 0.000000e+00 : f32
    %1 = vector.broadcast %cst_0 : f32 to vector<16x16xf32>
    %cst_1 = arith.constant 0.000000e+00 : f32
    %2 = vector.broadcast %cst_1 : f32 to vector<16x16xf32>
    %c0 = arith.constant 0 : index
    %c0_2 = arith.constant 0 : index
    %c0_3 = arith.constant 0 : index
    %c0_4 = arith.constant 0 : index
    %3 = vector.load %arg3[%c0, %c0_2, %c0_3, %c0_4] : memref<1x3x18x18xf32, #tpu.memory_space<vmem>>, vector<1x1x18x18xf32>
    %4 = vector.shape_cast %3 : vector<1x1x18x18xf32> to vector<18x18xf32>
    %5 = vector.extract_strided_slice %4 {offsets = [0, 0], sizes = [16, 16], strides = [1, 1]} : vector<18x18xf32> to vector<16x16xf32>
    %c0_5 = arith.constant 0 : index
    %6 = memref.load %arg1[%c0_5] : memref<81xf32, #tpu.memory_space<smem>>
    %7 = vector.broadcast %6 : f32 to vector<16x16xf32>
    %8 = arith.mulf %5, %7 : vector<16x16xf32>
    %9 = arith.addf %0, %8 : vector<16x16xf32>
    %c27 = arith.constant 27 : index
    %10 = memref.load %arg1[%c27] : memref<81xf32, #tpu.memory_space<smem>>
    %11 = vector.broadcast %10 : f32 to vector<16x16xf32>
    %12 = arith.mulf %5, %11 : vector<16x16xf32>
    %13 = arith.addf %1, %12 : vector<16x16xf32>
    %c54 = arith.constant 54 : index
    %14 = memref.load %arg1[%c54] : memref<81xf32, #tpu.memory_space<smem>>
    %15 = vector.broadcast %14 : f32 to vector<16x16xf32>
    %16 = arith.mulf %5, %15 : vector<16x16xf32>
    %17 = arith.addf %2, %16 : vector<16x16xf32>
    %18 = vector.extract_strided_slice %4 {offsets = [0, 1], sizes = [16, 16], strides = [1, 1]} : vector<18x18xf32> to vector<16x16xf32>
    %c1 = arith.constant 1 : index
    %19 = memref.load %arg1[%c1] : memref<81xf32, #tpu.memory_space<smem>>
    %20 = vector.broadcast %19 : f32 to vector<16x16xf32>
    %21 = arith.mulf %18, %20 : vector<16x16xf32>
    %22 = arith.addf %9, %21 : vector<16x16xf32>
    %c28 = arith.constant 28 : index
    %23 = memref.load %arg1[%c28] : memref<81xf32, #tpu.memory_space<smem>>
    %24 = vector.broadcast %23 : f32 to vector<16x16xf32>
    %25 = arith.mulf %18, %24 : vector<16x16xf32>
    %26 = arith.addf %13, %25 : vector<16x16xf32>
    %c55 = arith.constant 55 : index
    %27 = memref.load %arg1[%c55] : memref<81xf32, #tpu.memory_space<smem>>
    %28 = vector.broadcast %27 : f32 to vector<16x16xf32>
    %29 = arith.mulf %18, %28 : vector<16x16xf32>
    %30 = arith.addf %17, %29 : vector<16x16xf32>
    %31 = vector.extract_strided_slice %4 {offsets = [0, 2], sizes = [16, 16], strides = [1, 1]} : vector<18x18xf32> to vector<16x16xf32>
    %c2 = arith.constant 2 : index
    %32 = memref.load %arg1[%c2] : memref<81xf32, #tpu.memory_space<smem>>
    %33 = vector.broadcast %32 : f32 to vector<16x16xf32>
    %34 = arith.mulf %31, %33 : vector<16x16xf32>
    %35 = arith.addf %22, %34 : vector<16x16xf32>
    %c29 = arith.constant 29 : index
    %36 = memref.load %arg1[%c29] : memref<81xf32, #tpu.memory_space<smem>>
    %37 = vector.broadcast %36 : f32 to vector<16x16xf32>
    %38 = arith.mulf %31, %37 : vector<16x16xf32>
    %39 = arith.addf %26, %38 : vector<16x16xf32>
    %c56 = arith.constant 56 : index
    %40 = memref.load %arg1[%c56] : memref<81xf32, #tpu.memory_space<smem>>
    %41 = vector.broadcast %40 : f32 to vector<16x16xf32>
    %42 = arith.mulf %31, %41 : vector<16x16xf32>
    %43 = arith.addf %30, %42 : vector<16x16xf32>
    %44 = vector.extract_strided_slice %4 {offsets = [1, 0], sizes = [16, 16], strides = [1, 1]} : vector<18x18xf32> to vector<16x16xf32>
    %c3 = arith.constant 3 : index
    %45 = memref.load %arg1[%c3] : memref<81xf32, #tpu.memory_space<smem>>
    %46 = vector.broadcast %45 : f32 to vector<16x16xf32>
    %47 = arith.mulf %44, %46 : vector<16x16xf32>
    %48 = arith.addf %35, %47 : vector<16x16xf32>
    %c30 = arith.constant 30 : index
    %49 = memref.load %arg1[%c30] : memref<81xf32, #tpu.memory_space<smem>>
    %50 = vector.broadcast %49 : f32 to vector<16x16xf32>
    %51 = arith.mulf %44, %50 : vector<16x16xf32>
    %52 = arith.addf %39, %51 : vector<16x16xf32>
    %c57 = arith.constant 57 : index
    %53 = memref.load %arg1[%c57] : memref<81xf32, #tpu.memory_space<smem>>
    %54 = vector.broadcast %53 : f32 to vector<16x16xf32>
    %55 = arith.mulf %44, %54 : vector<16x16xf32>
    %56 = arith.addf %43, %55 : vector<16x16xf32>
    %57 = vector.extract_strided_slice %4 {offsets = [1, 1], sizes = [16, 16], strides = [1, 1]} : vector<18x18xf32> to vector<16x16xf32>
    %c4 = arith.constant 4 : index
    %58 = memref.load %arg1[%c4] : memref<81xf32, #tpu.memory_space<smem>>
    %59 = vector.broadcast %58 : f32 to vector<16x16xf32>
    %60 = arith.mulf %57, %59 : vector<16x16xf32>
    %61 = arith.addf %48, %60 : vector<16x16xf32>
    %c31 = arith.constant 31 : index
    %62 = memref.load %arg1[%c31] : memref<81xf32, #tpu.memory_space<smem>>
    %63 = vector.broadcast %62 : f32 to vector<16x16xf32>
    %64 = arith.mulf %57, %63 : vector<16x16xf32>
    %65 = arith.addf %52, %64 : vector<16x16xf32>
    %c58 = arith.constant 58 : index
    %66 = memref.load %arg1[%c58] : memref<81xf32, #tpu.memory_space<smem>>
    %67 = vector.broadcast %66 : f32 to vector<16x16xf32>
    %68 = arith.mulf %57, %67 : vector<16x16xf32>
    %69 = arith.addf %56, %68 : vector<16x16xf32>
    %70 = vector.extract_strided_slice %4 {offsets = [1, 2], sizes = [16, 16], strides = [1, 1]} : vector<18x18xf32> to vector<16x16xf32>
    %c5 = arith.constant 5 : index
    %71 = memref.load %arg1[%c5] : memref<81xf32, #tpu.memory_space<smem>>
    %72 = vector.broadcast %71 : f32 to vector<16x16xf32>
    %73 = arith.mulf %70, %72 : vector<16x16xf32>
    %74 = arith.addf %61, %73 : vector<16x16xf32>
    %c32 = arith.constant 32 : index
    %75 = memref.load %arg1[%c32] : memref<81xf32, #tpu.memory_space<smem>>
    %76 = vector.broadcast %75 : f32 to vector<16x16xf32>
    %77 = arith.mulf %70, %76 : vector<16x16xf32>
    %78 = arith.addf %65, %77 : vector<16x16xf32>
    %c59 = arith.constant 59 : index
    %79 = memref.load %arg1[%c59] : memref<81xf32, #tpu.memory_space<smem>>
    %80 = vector.broadcast %79 : f32 to vector<16x16xf32>
    %81 = arith.mulf %70, %80 : vector<16x16xf32>
    %82 = arith.addf %69, %81 : vector<16x16xf32>
    %83 = vector.extract_strided_slice %4 {offsets = [2, 0], sizes = [16, 16], strides = [1, 1]} : vector<18x18xf32> to vector<16x16xf32>
    %c6 = arith.constant 6 : index
    %84 = memref.load %arg1[%c6] : memref<81xf32, #tpu.memory_space<smem>>
    %85 = vector.broadcast %84 : f32 to vector<16x16xf32>
    %86 = arith.mulf %83, %85 : vector<16x16xf32>
    %87 = arith.addf %74, %86 : vector<16x16xf32>
    %c33 = arith.constant 33 : index
    %88 = memref.load %arg1[%c33] : memref<81xf32, #tpu.memory_space<smem>>
    %89 = vector.broadcast %88 : f32 to vector<16x16xf32>
    %90 = arith.mulf %83, %89 : vector<16x16xf32>
    %91 = arith.addf %78, %90 : vector<16x16xf32>
    %c60 = arith.constant 60 : index
    %92 = memref.load %arg1[%c60] : memref<81xf32, #tpu.memory_space<smem>>
    %93 = vector.broadcast %92 : f32 to vector<16x16xf32>
    %94 = arith.mulf %83, %93 : vector<16x16xf32>
    %95 = arith.addf %82, %94 : vector<16x16xf32>
    %96 = vector.extract_strided_slice %4 {offsets = [2, 1], sizes = [16, 16], strides = [1, 1]} : vector<18x18xf32> to vector<16x16xf32>
    %c7 = arith.constant 7 : index
    %97 = memref.load %arg1[%c7] : memref<81xf32, #tpu.memory_space<smem>>
    %98 = vector.broadcast %97 : f32 to vector<16x16xf32>
    %99 = arith.mulf %96, %98 : vector<16x16xf32>
    %100 = arith.addf %87, %99 : vector<16x16xf32>
    %c34 = arith.constant 34 : index
    %101 = memref.load %arg1[%c34] : memref<81xf32, #tpu.memory_space<smem>>
    %102 = vector.broadcast %101 : f32 to vector<16x16xf32>
    %103 = arith.mulf %96, %102 : vector<16x16xf32>
    %104 = arith.addf %91, %103 : vector<16x16xf32>
    %c61 = arith.constant 61 : index
    %105 = memref.load %arg1[%c61] : memref<81xf32, #tpu.memory_space<smem>>
    %106 = vector.broadcast %105 : f32 to vector<16x16xf32>
    %107 = arith.mulf %96, %106 : vector<16x16xf32>
    %108 = arith.addf %95, %107 : vector<16x16xf32>
    %109 = vector.extract_strided_slice %4 {offsets = [2, 2], sizes = [16, 16], strides = [1, 1]} : vector<18x18xf32> to vector<16x16xf32>
    %c8 = arith.constant 8 : index
    %110 = memref.load %arg1[%c8] : memref<81xf32, #tpu.memory_space<smem>>
    %111 = vector.broadcast %110 : f32 to vector<16x16xf32>
    %112 = arith.mulf %109, %111 : vector<16x16xf32>
    %113 = arith.addf %100, %112 : vector<16x16xf32>
    %c35 = arith.constant 35 : index
    %114 = memref.load %arg1[%c35] : memref<81xf32, #tpu.memory_space<smem>>
    %115 = vector.broadcast %114 : f32 to vector<16x16xf32>
    %116 = arith.mulf %109, %115 : vector<16x16xf32>
    %117 = arith.addf %104, %116 : vector<16x16xf32>
    %c62 = arith.constant 62 : index
    %118 = memref.load %arg1[%c62] : memref<81xf32, #tpu.memory_space<smem>>
    %119 = vector.broadcast %118 : f32 to vector<16x16xf32>
    %120 = arith.mulf %109, %119 : vector<16x16xf32>
    %121 = arith.addf %108, %120 : vector<16x16xf32>
    %c0_6 = arith.constant 0 : index
    %c1_7 = arith.constant 1 : index
    %c0_8 = arith.constant 0 : index
    %c0_9 = arith.constant 0 : index
    %122 = vector.load %arg3[%c0_6, %c1_7, %c0_8, %c0_9] : memref<1x3x18x18xf32, #tpu.memory_space<vmem>>, vector<1x1x18x18xf32>
    %123 = vector.shape_cast %122 : vector<1x1x18x18xf32> to vector<18x18xf32>
    %124 = vector.extract_strided_slice %123 {offsets = [0, 0], sizes = [16, 16], strides = [1, 1]} : vector<18x18xf32> to vector<16x16xf32>
    %c9 = arith.constant 9 : index
    %125 = memref.load %arg1[%c9] : memref<81xf32, #tpu.memory_space<smem>>
    %126 = vector.broadcast %125 : f32 to vector<16x16xf32>
    %127 = arith.mulf %124, %126 : vector<16x16xf32>
    %128 = arith.addf %113, %127 : vector<16x16xf32>
    %c36 = arith.constant 36 : index
    %129 = memref.load %arg1[%c36] : memref<81xf32, #tpu.memory_space<smem>>
    %130 = vector.broadcast %129 : f32 to vector<16x16xf32>
    %131 = arith.mulf %124, %130 : vector<16x16xf32>
    %132 = arith.addf %117, %131 : vector<16x16xf32>
    %c63 = arith.constant 63 : index
    %133 = memref.load %arg1[%c63] : memref<81xf32, #tpu.memory_space<smem>>
    %134 = vector.broadcast %133 : f32 to vector<16x16xf32>
    %135 = arith.mulf %124, %134 : vector<16x16xf32>
    %136 = arith.addf %121, %135 : vector<16x16xf32>
    %137 = vector.extract_strided_slice %123 {offsets = [0, 1], sizes = [16, 16], strides = [1, 1]} : vector<18x18xf32> to vector<16x16xf32>
    %c10 = arith.constant 10 : index
    %138 = memref.load %arg1[%c10] : memref<81xf32, #tpu.memory_space<smem>>
    %139 = vector.broadcast %138 : f32 to vector<16x16xf32>
    %140 = arith.mulf %137, %139 : vector<16x16xf32>
    %141 = arith.addf %128, %140 : vector<16x16xf32>
    %c37 = arith.constant 37 : index
    %142 = memref.load %arg1[%c37] : memref<81xf32, #tpu.memory_space<smem>>
    %143 = vector.broadcast %142 : f32 to vector<16x16xf32>
    %144 = arith.mulf %137, %143 : vector<16x16xf32>
    %145 = arith.addf %132, %144 : vector<16x16xf32>
    %c64 = arith.constant 64 : index
    %146 = memref.load %arg1[%c64] : memref<81xf32, #tpu.memory_space<smem>>
    %147 = vector.broadcast %146 : f32 to vector<16x16xf32>
    %148 = arith.mulf %137, %147 : vector<16x16xf32>
    %149 = arith.addf %136, %148 : vector<16x16xf32>
    %150 = vector.extract_strided_slice %123 {offsets = [0, 2], sizes = [16, 16], strides = [1, 1]} : vector<18x18xf32> to vector<16x16xf32>
    %c11 = arith.constant 11 : index
    %151 = memref.load %arg1[%c11] : memref<81xf32, #tpu.memory_space<smem>>
    %152 = vector.broadcast %151 : f32 to vector<16x16xf32>
    %153 = arith.mulf %150, %152 : vector<16x16xf32>
    %154 = arith.addf %141, %153 : vector<16x16xf32>
    %c38 = arith.constant 38 : index
    %155 = memref.load %arg1[%c38] : memref<81xf32, #tpu.memory_space<smem>>
    %156 = vector.broadcast %155 : f32 to vector<16x16xf32>
    %157 = arith.mulf %150, %156 : vector<16x16xf32>
    %158 = arith.addf %145, %157 : vector<16x16xf32>
    %c65 = arith.constant 65 : index
    %159 = memref.load %arg1[%c65] : memref<81xf32, #tpu.memory_space<smem>>
    %160 = vector.broadcast %159 : f32 to vector<16x16xf32>
    %161 = arith.mulf %150, %160 : vector<16x16xf32>
    %162 = arith.addf %149, %161 : vector<16x16xf32>
    %163 = vector.extract_strided_slice %123 {offsets = [1, 0], sizes = [16, 16], strides = [1, 1]} : vector<18x18xf32> to vector<16x16xf32>
    %c12 = arith.constant 12 : index
    %164 = memref.load %arg1[%c12] : memref<81xf32, #tpu.memory_space<smem>>
    %165 = vector.broadcast %164 : f32 to vector<16x16xf32>
    %166 = arith.mulf %163, %165 : vector<16x16xf32>
    %167 = arith.addf %154, %166 : vector<16x16xf32>
    %c39 = arith.constant 39 : index
    %168 = memref.load %arg1[%c39] : memref<81xf32, #tpu.memory_space<smem>>
    %169 = vector.broadcast %168 : f32 to vector<16x16xf32>
    %170 = arith.mulf %163, %169 : vector<16x16xf32>
    %171 = arith.addf %158, %170 : vector<16x16xf32>
    %c66 = arith.constant 66 : index
    %172 = memref.load %arg1[%c66] : memref<81xf32, #tpu.memory_space<smem>>
    %173 = vector.broadcast %172 : f32 to vector<16x16xf32>
    %174 = arith.mulf %163, %173 : vector<16x16xf32>
    %175 = arith.addf %162, %174 : vector<16x16xf32>
    %176 = vector.extract_strided_slice %123 {offsets = [1, 1], sizes = [16, 16], strides = [1, 1]} : vector<18x18xf32> to vector<16x16xf32>
    %c13 = arith.constant 13 : index
    %177 = memref.load %arg1[%c13] : memref<81xf32, #tpu.memory_space<smem>>
    %178 = vector.broadcast %177 : f32 to vector<16x16xf32>
    %179 = arith.mulf %176, %178 : vector<16x16xf32>
    %180 = arith.addf %167, %179 : vector<16x16xf32>
    %c40 = arith.constant 40 : index
    %181 = memref.load %arg1[%c40] : memref<81xf32, #tpu.memory_space<smem>>
    %182 = vector.broadcast %181 : f32 to vector<16x16xf32>
    %183 = arith.mulf %176, %182 : vector<16x16xf32>
    %184 = arith.addf %171, %183 : vector<16x16xf32>
    %c67 = arith.constant 67 : index
    %185 = memref.load %arg1[%c67] : memref<81xf32, #tpu.memory_space<smem>>
    %186 = vector.broadcast %185 : f32 to vector<16x16xf32>
    %187 = arith.mulf %176, %186 : vector<16x16xf32>
    %188 = arith.addf %175, %187 : vector<16x16xf32>
    %189 = vector.extract_strided_slice %123 {offsets = [1, 2], sizes = [16, 16], strides = [1, 1]} : vector<18x18xf32> to vector<16x16xf32>
    %c14 = arith.constant 14 : index
    %190 = memref.load %arg1[%c14] : memref<81xf32, #tpu.memory_space<smem>>
    %191 = vector.broadcast %190 : f32 to vector<16x16xf32>
    %192 = arith.mulf %189, %191 : vector<16x16xf32>
    %193 = arith.addf %180, %192 : vector<16x16xf32>
    %c41 = arith.constant 41 : index
    %194 = memref.load %arg1[%c41] : memref<81xf32, #tpu.memory_space<smem>>
    %195 = vector.broadcast %194 : f32 to vector<16x16xf32>
    %196 = arith.mulf %189, %195 : vector<16x16xf32>
    %197 = arith.addf %184, %196 : vector<16x16xf32>
    %c68 = arith.constant 68 : index
    %198 = memref.load %arg1[%c68] : memref<81xf32, #tpu.memory_space<smem>>
    %199 = vector.broadcast %198 : f32 to vector<16x16xf32>
    %200 = arith.mulf %189, %199 : vector<16x16xf32>
    %201 = arith.addf %188, %200 : vector<16x16xf32>
    %202 = vector.extract_strided_slice %123 {offsets = [2, 0], sizes = [16, 16], strides = [1, 1]} : vector<18x18xf32> to vector<16x16xf32>
    %c15 = arith.constant 15 : index
    %203 = memref.load %arg1[%c15] : memref<81xf32, #tpu.memory_space<smem>>
    %204 = vector.broadcast %203 : f32 to vector<16x16xf32>
    %205 = arith.mulf %202, %204 : vector<16x16xf32>
    %206 = arith.addf %193, %205 : vector<16x16xf32>
    %c42 = arith.constant 42 : index
    %207 = memref.load %arg1[%c42] : memref<81xf32, #tpu.memory_space<smem>>
    %208 = vector.broadcast %207 : f32 to vector<16x16xf32>
    %209 = arith.mulf %202, %208 : vector<16x16xf32>
    %210 = arith.addf %197, %209 : vector<16x16xf32>
    %c69 = arith.constant 69 : index
    %211 = memref.load %arg1[%c69] : memref<81xf32, #tpu.memory_space<smem>>
    %212 = vector.broadcast %211 : f32 to vector<16x16xf32>
    %213 = arith.mulf %202, %212 : vector<16x16xf32>
    %214 = arith.addf %201, %213 : vector<16x16xf32>
    %215 = vector.extract_strided_slice %123 {offsets = [2, 1], sizes = [16, 16], strides = [1, 1]} : vector<18x18xf32> to vector<16x16xf32>
    %c16 = arith.constant 16 : index
    %216 = memref.load %arg1[%c16] : memref<81xf32, #tpu.memory_space<smem>>
    %217 = vector.broadcast %216 : f32 to vector<16x16xf32>
    %218 = arith.mulf %215, %217 : vector<16x16xf32>
    %219 = arith.addf %206, %218 : vector<16x16xf32>
    %c43 = arith.constant 43 : index
    %220 = memref.load %arg1[%c43] : memref<81xf32, #tpu.memory_space<smem>>
    %221 = vector.broadcast %220 : f32 to vector<16x16xf32>
    %222 = arith.mulf %215, %221 : vector<16x16xf32>
    %223 = arith.addf %210, %222 : vector<16x16xf32>
    %c70 = arith.constant 70 : index
    %224 = memref.load %arg1[%c70] : memref<81xf32, #tpu.memory_space<smem>>
    %225 = vector.broadcast %224 : f32 to vector<16x16xf32>
    %226 = arith.mulf %215, %225 : vector<16x16xf32>
    %227 = arith.addf %214, %226 : vector<16x16xf32>
    %228 = vector.extract_strided_slice %123 {offsets = [2, 2], sizes = [16, 16], strides = [1, 1]} : vector<18x18xf32> to vector<16x16xf32>
    %c17 = arith.constant 17 : index
    %229 = memref.load %arg1[%c17] : memref<81xf32, #tpu.memory_space<smem>>
    %230 = vector.broadcast %229 : f32 to vector<16x16xf32>
    %231 = arith.mulf %228, %230 : vector<16x16xf32>
    %232 = arith.addf %219, %231 : vector<16x16xf32>
    %c44 = arith.constant 44 : index
    %233 = memref.load %arg1[%c44] : memref<81xf32, #tpu.memory_space<smem>>
    %234 = vector.broadcast %233 : f32 to vector<16x16xf32>
    %235 = arith.mulf %228, %234 : vector<16x16xf32>
    %236 = arith.addf %223, %235 : vector<16x16xf32>
    %c71 = arith.constant 71 : index
    %237 = memref.load %arg1[%c71] : memref<81xf32, #tpu.memory_space<smem>>
    %238 = vector.broadcast %237 : f32 to vector<16x16xf32>
    %239 = arith.mulf %228, %238 : vector<16x16xf32>
    %240 = arith.addf %227, %239 : vector<16x16xf32>
    %c0_10 = arith.constant 0 : index
    %c2_11 = arith.constant 2 : index
    %c0_12 = arith.constant 0 : index
    %c0_13 = arith.constant 0 : index
    %241 = vector.load %arg3[%c0_10, %c2_11, %c0_12, %c0_13] : memref<1x3x18x18xf32, #tpu.memory_space<vmem>>, vector<1x1x18x18xf32>
    %242 = vector.shape_cast %241 : vector<1x1x18x18xf32> to vector<18x18xf32>
    %243 = vector.extract_strided_slice %242 {offsets = [0, 0], sizes = [16, 16], strides = [1, 1]} : vector<18x18xf32> to vector<16x16xf32>
    %c18 = arith.constant 18 : index
    %244 = memref.load %arg1[%c18] : memref<81xf32, #tpu.memory_space<smem>>
    %245 = vector.broadcast %244 : f32 to vector<16x16xf32>
    %246 = arith.mulf %243, %245 : vector<16x16xf32>
    %247 = arith.addf %232, %246 : vector<16x16xf32>
    %c45 = arith.constant 45 : index
    %248 = memref.load %arg1[%c45] : memref<81xf32, #tpu.memory_space<smem>>
    %249 = vector.broadcast %248 : f32 to vector<16x16xf32>
    %250 = arith.mulf %243, %249 : vector<16x16xf32>
    %251 = arith.addf %236, %250 : vector<16x16xf32>
    %c72 = arith.constant 72 : index
    %252 = memref.load %arg1[%c72] : memref<81xf32, #tpu.memory_space<smem>>
    %253 = vector.broadcast %252 : f32 to vector<16x16xf32>
    %254 = arith.mulf %243, %253 : vector<16x16xf32>
    %255 = arith.addf %240, %254 : vector<16x16xf32>
    %256 = vector.extract_strided_slice %242 {offsets = [0, 1], sizes = [16, 16], strides = [1, 1]} : vector<18x18xf32> to vector<16x16xf32>
    %c19 = arith.constant 19 : index
    %257 = memref.load %arg1[%c19] : memref<81xf32, #tpu.memory_space<smem>>
    %258 = vector.broadcast %257 : f32 to vector<16x16xf32>
    %259 = arith.mulf %256, %258 : vector<16x16xf32>
    %260 = arith.addf %247, %259 : vector<16x16xf32>
    %c46 = arith.constant 46 : index
    %261 = memref.load %arg1[%c46] : memref<81xf32, #tpu.memory_space<smem>>
    %262 = vector.broadcast %261 : f32 to vector<16x16xf32>
    %263 = arith.mulf %256, %262 : vector<16x16xf32>
    %264 = arith.addf %251, %263 : vector<16x16xf32>
    %c73 = arith.constant 73 : index
    %265 = memref.load %arg1[%c73] : memref<81xf32, #tpu.memory_space<smem>>
    %266 = vector.broadcast %265 : f32 to vector<16x16xf32>
    %267 = arith.mulf %256, %266 : vector<16x16xf32>
    %268 = arith.addf %255, %267 : vector<16x16xf32>
    %269 = vector.extract_strided_slice %242 {offsets = [0, 2], sizes = [16, 16], strides = [1, 1]} : vector<18x18xf32> to vector<16x16xf32>
    %c20 = arith.constant 20 : index
    %270 = memref.load %arg1[%c20] : memref<81xf32, #tpu.memory_space<smem>>
    %271 = vector.broadcast %270 : f32 to vector<16x16xf32>
    %272 = arith.mulf %269, %271 : vector<16x16xf32>
    %273 = arith.addf %260, %272 : vector<16x16xf32>
    %c47 = arith.constant 47 : index
    %274 = memref.load %arg1[%c47] : memref<81xf32, #tpu.memory_space<smem>>
    %275 = vector.broadcast %274 : f32 to vector<16x16xf32>
    %276 = arith.mulf %269, %275 : vector<16x16xf32>
    %277 = arith.addf %264, %276 : vector<16x16xf32>
    %c74 = arith.constant 74 : index
    %278 = memref.load %arg1[%c74] : memref<81xf32, #tpu.memory_space<smem>>
    %279 = vector.broadcast %278 : f32 to vector<16x16xf32>
    %280 = arith.mulf %269, %279 : vector<16x16xf32>
    %281 = arith.addf %268, %280 : vector<16x16xf32>
    %282 = vector.extract_strided_slice %242 {offsets = [1, 0], sizes = [16, 16], strides = [1, 1]} : vector<18x18xf32> to vector<16x16xf32>
    %c21 = arith.constant 21 : index
    %283 = memref.load %arg1[%c21] : memref<81xf32, #tpu.memory_space<smem>>
    %284 = vector.broadcast %283 : f32 to vector<16x16xf32>
    %285 = arith.mulf %282, %284 : vector<16x16xf32>
    %286 = arith.addf %273, %285 : vector<16x16xf32>
    %c48 = arith.constant 48 : index
    %287 = memref.load %arg1[%c48] : memref<81xf32, #tpu.memory_space<smem>>
    %288 = vector.broadcast %287 : f32 to vector<16x16xf32>
    %289 = arith.mulf %282, %288 : vector<16x16xf32>
    %290 = arith.addf %277, %289 : vector<16x16xf32>
    %c75 = arith.constant 75 : index
    %291 = memref.load %arg1[%c75] : memref<81xf32, #tpu.memory_space<smem>>
    %292 = vector.broadcast %291 : f32 to vector<16x16xf32>
    %293 = arith.mulf %282, %292 : vector<16x16xf32>
    %294 = arith.addf %281, %293 : vector<16x16xf32>
    %295 = vector.extract_strided_slice %242 {offsets = [1, 1], sizes = [16, 16], strides = [1, 1]} : vector<18x18xf32> to vector<16x16xf32>
    %c22 = arith.constant 22 : index
    %296 = memref.load %arg1[%c22] : memref<81xf32, #tpu.memory_space<smem>>
    %297 = vector.broadcast %296 : f32 to vector<16x16xf32>
    %298 = arith.mulf %295, %297 : vector<16x16xf32>
    %299 = arith.addf %286, %298 : vector<16x16xf32>
    %c49 = arith.constant 49 : index
    %300 = memref.load %arg1[%c49] : memref<81xf32, #tpu.memory_space<smem>>
    %301 = vector.broadcast %300 : f32 to vector<16x16xf32>
    %302 = arith.mulf %295, %301 : vector<16x16xf32>
    %303 = arith.addf %290, %302 : vector<16x16xf32>
    %c76 = arith.constant 76 : index
    %304 = memref.load %arg1[%c76] : memref<81xf32, #tpu.memory_space<smem>>
    %305 = vector.broadcast %304 : f32 to vector<16x16xf32>
    %306 = arith.mulf %295, %305 : vector<16x16xf32>
    %307 = arith.addf %294, %306 : vector<16x16xf32>
    %308 = vector.extract_strided_slice %242 {offsets = [1, 2], sizes = [16, 16], strides = [1, 1]} : vector<18x18xf32> to vector<16x16xf32>
    %c23 = arith.constant 23 : index
    %309 = memref.load %arg1[%c23] : memref<81xf32, #tpu.memory_space<smem>>
    %310 = vector.broadcast %309 : f32 to vector<16x16xf32>
    %311 = arith.mulf %308, %310 : vector<16x16xf32>
    %312 = arith.addf %299, %311 : vector<16x16xf32>
    %c50 = arith.constant 50 : index
    %313 = memref.load %arg1[%c50] : memref<81xf32, #tpu.memory_space<smem>>
    %314 = vector.broadcast %313 : f32 to vector<16x16xf32>
    %315 = arith.mulf %308, %314 : vector<16x16xf32>
    %316 = arith.addf %303, %315 : vector<16x16xf32>
    %c77 = arith.constant 77 : index
    %317 = memref.load %arg1[%c77] : memref<81xf32, #tpu.memory_space<smem>>
    %318 = vector.broadcast %317 : f32 to vector<16x16xf32>
    %319 = arith.mulf %308, %318 : vector<16x16xf32>
    %320 = arith.addf %307, %319 : vector<16x16xf32>
    %321 = vector.extract_strided_slice %242 {offsets = [2, 0], sizes = [16, 16], strides = [1, 1]} : vector<18x18xf32> to vector<16x16xf32>
    %c24 = arith.constant 24 : index
    %322 = memref.load %arg1[%c24] : memref<81xf32, #tpu.memory_space<smem>>
    %323 = vector.broadcast %322 : f32 to vector<16x16xf32>
    %324 = arith.mulf %321, %323 : vector<16x16xf32>
    %325 = arith.addf %312, %324 : vector<16x16xf32>
    %c51 = arith.constant 51 : index
    %326 = memref.load %arg1[%c51] : memref<81xf32, #tpu.memory_space<smem>>
    %327 = vector.broadcast %326 : f32 to vector<16x16xf32>
    %328 = arith.mulf %321, %327 : vector<16x16xf32>
    %329 = arith.addf %316, %328 : vector<16x16xf32>
    %c78 = arith.constant 78 : index
    %330 = memref.load %arg1[%c78] : memref<81xf32, #tpu.memory_space<smem>>
    %331 = vector.broadcast %330 : f32 to vector<16x16xf32>
    %332 = arith.mulf %321, %331 : vector<16x16xf32>
    %333 = arith.addf %320, %332 : vector<16x16xf32>
    %334 = vector.extract_strided_slice %242 {offsets = [2, 1], sizes = [16, 16], strides = [1, 1]} : vector<18x18xf32> to vector<16x16xf32>
    %c25 = arith.constant 25 : index
    %335 = memref.load %arg1[%c25] : memref<81xf32, #tpu.memory_space<smem>>
    %336 = vector.broadcast %335 : f32 to vector<16x16xf32>
    %337 = arith.mulf %334, %336 : vector<16x16xf32>
    %338 = arith.addf %325, %337 : vector<16x16xf32>
    %c52 = arith.constant 52 : index
    %339 = memref.load %arg1[%c52] : memref<81xf32, #tpu.memory_space<smem>>
    %340 = vector.broadcast %339 : f32 to vector<16x16xf32>
    %341 = arith.mulf %334, %340 : vector<16x16xf32>
    %342 = arith.addf %329, %341 : vector<16x16xf32>
    %c79 = arith.constant 79 : index
    %343 = memref.load %arg1[%c79] : memref<81xf32, #tpu.memory_space<smem>>
    %344 = vector.broadcast %343 : f32 to vector<16x16xf32>
    %345 = arith.mulf %334, %344 : vector<16x16xf32>
    %346 = arith.addf %333, %345 : vector<16x16xf32>
    %347 = vector.extract_strided_slice %242 {offsets = [2, 2], sizes = [16, 16], strides = [1, 1]} : vector<18x18xf32> to vector<16x16xf32>
    %c26 = arith.constant 26 : index
    %348 = memref.load %arg1[%c26] : memref<81xf32, #tpu.memory_space<smem>>
    %349 = vector.broadcast %348 : f32 to vector<16x16xf32>
    %350 = arith.mulf %347, %349 : vector<16x16xf32>
    %351 = arith.addf %338, %350 : vector<16x16xf32>
    %c53 = arith.constant 53 : index
    %352 = memref.load %arg1[%c53] : memref<81xf32, #tpu.memory_space<smem>>
    %353 = vector.broadcast %352 : f32 to vector<16x16xf32>
    %354 = arith.mulf %347, %353 : vector<16x16xf32>
    %355 = arith.addf %342, %354 : vector<16x16xf32>
    %c80 = arith.constant 80 : index
    %356 = memref.load %arg1[%c80] : memref<81xf32, #tpu.memory_space<smem>>
    %357 = vector.broadcast %356 : f32 to vector<16x16xf32>
    %358 = arith.mulf %347, %357 : vector<16x16xf32>
    %359 = arith.addf %346, %358 : vector<16x16xf32>
    %c0_14 = arith.constant 0 : index
    %c0_15 = arith.constant 0 : index
    %c1_16 = arith.constant 1 : index
    %c1_17 = arith.constant 1 : index
    %360 = vector.load %arg3[%c0_14, %c0_15, %c1_16, %c1_17] : memref<1x3x18x18xf32, #tpu.memory_space<vmem>>, vector<1x1x16x16xf32>
    %361 = vector.shape_cast %360 : vector<1x1x16x16xf32> to vector<16x16xf32>
    %cst_18 = arith.constant 0.000000e+00 : f32
    %362 = vector.broadcast %cst_18 : f32 to vector<16x16xf32>
    %363 = arith.maximumf %361, %362 : vector<16x16xf32>
    %c0_19 = arith.constant 0 : index
    %364 = memref.load %arg2[%c0_19] : memref<3xf32, #tpu.memory_space<smem>>
    %365 = vector.broadcast %364 : f32 to vector<16x16xf32>
    %366 = arith.addf %351, %365 : vector<16x16xf32>
    %367 = arith.addf %366, %363 : vector<16x16xf32>
    %c0_20 = arith.constant 0 : index
    %c0_21 = arith.constant 0 : index
    %c0_22 = arith.constant 0 : index
    %c0_23 = arith.constant 0 : index
    %368 = vector.load %arg4[%c0_20, %c0_21, %c0_22, %c0_23] : memref<1x3x16x16xf32, #tpu.memory_space<vmem>>, vector<1x1x16x16xf32>
    %369 = vector.shape_cast %368 : vector<1x1x16x16xf32> to vector<16x16xf32>
    %370 = vector.shape_cast %367 : vector<16x16xf32> to vector<1x1x16x16xf32>
    tpu.vector_store %arg4[%c0_20, %c0_21, %c0_22, %c0_23], %370 {strides = array<i32>} : memref<1x3x16x16xf32, #tpu.memory_space<vmem>>, vector<1x1x16x16xf32>,
    %c0_24 = arith.constant 0 : index
    %c1_25 = arith.constant 1 : index
    %c1_26 = arith.constant 1 : index
    %c1_27 = arith.constant 1 : index
    %371 = vector.load %arg3[%c0_24, %c1_25, %c1_26, %c1_27] : memref<1x3x18x18xf32, #tpu.memory_space<vmem>>, vector<1x1x16x16xf32>
    %372 = vector.shape_cast %371 : vector<1x1x16x16xf32> to vector<16x16xf32>
    %cst_28 = arith.constant 0.000000e+00 : f32
    %373 = vector.broadcast %cst_28 : f32 to vector<16x16xf32>
    %374 = arith.maximumf %372, %373 : vector<16x16xf32>
    %c1_29 = arith.constant 1 : index
    %375 = memref.load %arg2[%c1_29] : memref<3xf32, #tpu.memory_space<smem>>
    %376 = vector.broadcast %375 : f32 to vector<16x16xf32>
    %377 = arith.addf %355, %376 : vector<16x16xf32>
    %378 = arith.addf %377, %374 : vector<16x16xf32>
    %c0_30 = arith.constant 0 : index
    %c1_31 = arith.constant 1 : index
    %c0_32 = arith.constant 0 : index
    %c0_33 = arith.constant 0 : index
    %379 = vector.load %arg4[%c0_30, %c1_31, %c0_32, %c0_33] : memref<1x3x16x16xf32, #tpu.memory_space<vmem>>, vector<1x1x16x16xf32>
    %380 = vector.shape_cast %379 : vector<1x1x16x16xf32> to vector<16x16xf32>
    %381 = vector.shape_cast %378 : vector<16x16xf32> to vector<1x1x16x16xf32>
    tpu.vector_store %arg4[%c0_30, %c1_31, %c0_32, %c0_33], %381 {strides = array<i32>} : memref<1x3x16x16xf32, #tpu.memory_space<vmem>>, vector<1x1x16x16xf32>,
    %c0_34 = arith.constant 0 : index
    %c2_35 = arith.constant 2 : index
    %c1_36 = arith.constant 1 : index
    %c1_37 = arith.constant 1 : index
    %382 = vector.load %arg3[%c0_34, %c2_35, %c1_36, %c1_37] : memref<1x3x18x18xf32, #tpu.memory_space<vmem>>, vector<1x1x16x16xf32>
    %383 = vector.shape_cast %382 : vector<1x1x16x16xf32> to vector<16x16xf32>
    %cst_38 = arith.constant 0.000000e+00 : f32
    %384 = vector.broadcast %cst_38 : f32 to vector<16x16xf32>
    %385 = arith.maximumf %383, %384 : vector<16x16xf32>
    %c2_39 = arith.constant 2 : index
    %386 = memref.load %arg2[%c2_39] : memref<3xf32, #tpu.memory_space<smem>>
    %387 = vector.broadcast %386 : f32 to vector<16x16xf32>
    %388 = arith.addf %359, %387 : vector<16x16xf32>
    %389 = arith.addf %388, %385 : vector<16x16xf32>
    %c0_40 = arith.constant 0 : index
    %c2_41 = arith.constant 2 : index
    %c0_42 = arith.constant 0 : index
    %c0_43 = arith.constant 0 : index
    %390 = vector.load %arg4[%c0_40, %c2_41, %c0_42, %c0_43] : memref<1x3x16x16xf32, #tpu.memory_space<vmem>>, vector<1x1x16x16xf32>
    %391 = vector.shape_cast %390 : vector<1x1x16x16xf32> to vector<16x16xf32>
    %392 = vector.shape_cast %389 : vector<16x16xf32> to vector<1x1x16x16xf32>
    tpu.vector_store %arg4[%c0_40, %c2_41, %c0_42, %c0_43], %392 {strides = array<i32>} : memref<1x3x16x16xf32, #tpu.memory_space<vmem>>, vector<1x1x16x16xf32>,
    return
  }
  func.func @transform_0(%arg0: i32) -> i32 {
    %c0_i32 = arith.constant 0 : i32
    %c0_i32_0 = arith.constant 0 : i32
    return %c0_i32 : i32
  }
  func.func @transform_1(%arg0: i32) -> i32 {
    %c0_i32 = arith.constant 0 : i32
    %c0_i32_0 = arith.constant 0 : i32
    return %c0_i32 : i32
  }
  func.func @transform_2(%arg0: i32) -> (i32, i32, i32, i32) {
    %c0_i32 = arith.constant 0 : i32
    %c0_i32_0 = arith.constant 0 : i32
    %c0_i32_1 = arith.constant 0 : i32
    %c0_i32_2 = arith.constant 0 : i32
    return %arg0, %c0_i32, %c0_i32_0, %c0_i32_1 : i32, i32, i32, i32
  }
  func.func @transform_3(%arg0: i32) -> (i32, i32, i32, i32) {
    %c0_i32 = arith.constant 0 : i32
    %c0_i32_0 = arith.constant 0 : i32
    %c0_i32_1 = arith.constant 0 : i32
    %c0_i32_2 = arith.constant 0 : i32
    return %arg0, %c0_i32, %c0_i32_0, %c0_i32_1 : i32, i32, i32, i32
  }
}

</mosaic_0001>

<bundles_post_ra>
// kernel: tpu_custom_call.1
= control target key start
LH: loop header
LB: loop body
LE: loop exit
PB: predicated region body
PF: predicated region fallthrough
CT: control target
= control target key end

     0   :  { %8 = vsyncpa [#allocation4], 0  ;;  %s3044_s0 = inlined_call_operand.vmem [shape: f32[81], index: 0, kind: input, shape index: {}]   ;;  %s3045_s1 = inlined_call_operand.vmem [shape: f32[3], index: 1, kind: input, shape index: {}]   ;;  %s3046_s2 = inlined_call_operand.vmem [shape: f32[2,3,18,18], index: 2, kind: input, shape index: {}]   ;;  %s3047_s3 = inlined_call_operand.hbm [shape: f32[2,3,16,16], index: 3, kind: output, shape index: {}]  }
   0x1   :  { %9 = vsyncpa [#allocation6], 0 }
   0x2   :  { %10 = vsyncpa [#allocation3], 0 }
   0x3   :  { %12 = vsyncpa [#allocation3 + $0x1], 0  ;;  %s2048_s12 = smov 0   ;;  %s2050_s13 = smov 0  }
   0x4   :  { %s2052_s14 = smov 0   ;;  %s2054_s15 = smov 0  }
   0x5 LB: > { %s2069_s16 = sadd.s32 4294967295, %s2019_s15   ;;  %s1738_s17 = sadd.s32 4294967294, %s2019_s15   ;;  %s2019_s15 = sphi %s2054_s15, %s3067_s15   ;;  %s2015_s14 = sphi %s2052_s14, %s3066_s14   ;;  %s2011_s13 = sphi %s2050_s13, %s3065_s13   ;;  %s2007_s12 = sphi %s2048_s12, %s3064_s12  }
   0x6   : > { %s2073_s18 = sadd.s32 1, %s2019_s15   ;;  %s93_s19 = sadd.s32 1, %s2015_s14 }
   0x7   : > { %s90_s20 = ssub.s32 %s2019_s15, %s2073_s18  ;;  %p103_p0 = scmp.ne.s32.totalorder %s2015_s14, %s2011_s13 }
   0x8   : > { %p91_p1 = scmp.eq.s32.totalorder %s90_s20, 0  ;;  %p104_p2 = scmp.eq.s32.totalorder %s2069_s16, 1 }
   0x9   : > { %p109_p3 = scmp.ne.s32.totalorder %s2011_s13, %s2007_s12  ;;  %p110_p4 = scmp.eq.s32.totalorder %s1738_s17, 1 }
   0xa   : > { %s2084_s21 = scalar_select %p91_p1, %s2015_s14, %s93_s19  }
   0xb   : > { %p2086_p5 = por %p104_p2, %p103_p0  ;;  %p2090_p6 = por %p110_p4, %p109_p3 }
   0xc   : > { %p1739_p7 = scmp.ge.s32.totalorder %s2019_s15, 1  ;;  %p117_p8 = scmp.lt.s32.totalorder %s2019_s15, 3 }
   0xd   : > { %s3051_s22 = scalar_select %p2086_p5, 1, 0 }
   0xe   : > { %s3052_s23 = scalar_select %p2090_p6, 1, 0 }
   0xf   : > { %p3048_p9 = scmp.eq.s32.totalorder %s2069_s16, 0  ;;  %p2097_p10 = pnand %p1739_p7, %p117_p8 }
  0x10   : > { %s130_s27 = sshll.u32 %s3044_s0, 4  ;;  %s141_s30 = sshll.u32 %s3045_s1, 4  ;;  %s131_s27 = int_to_ptr.vmem [resolvable:$true] %s130_s27  ;;  %s142_s30 = int_to_ptr.vmem [resolvable:$true] %s141_s30 }
  0x11   : > { %s3053_s24 = scalar_select %p2097_p10, 1, 0 }
  0x12   : > { %p1859_p11 = pneg %p2097_p10  ;;  %s1921_s5 = scalar_lea.vmem %s131_s27, 16 }
  0x13   : > { %p1922_p13 = scmp.ne.s32.totalorder %s131_s27, %s1921_s5  ;;  %p1929_p3 = scmp.lt.s32.totalorder %s131_s27, %s131_s27 }
  0x14   : > { %p2111_p12 = pnand %p3048_p9, %p1859_p11  ;;  %p1930_p4 = scmp.lt.s32.totalorder %s1921_s5, %s1921_s5 }
  0x16   : > { %p1923_p0 = pneg %p2111_p12  ;;  %p1931_p7 = por %p1930_p4, %p1929_p3 }
  0x18   : > { %p1924_p1 = pnand %p1923_p0, %p1922_p13 }
  0x1a   : > { %p1925_p2 = pneg %p1924_p1 }
  0x1c   : > { %p1932_p8 = pnand %p1931_p7, %p1925_p2 }
  0x1e   : > { %1935 = shalt.err (!%p1932_p8)
}
  0x1f   : > { %s2021_s6 = smov [#allocation2]   ;;  %s1936_s7 = scalar_lea.vmem %s142_s30, 16 }
  0x20   : > { %1862 = dma.vmem_to_smem (!%p2111_p12), %s131_s27, 16, %s2021_s6, [#allocation4]  }
  0x21   : > { %p1937_p11 = scmp.ne.s32.totalorder %s142_s30, %s1936_s7  ;;  %p1944_p5 = scmp.lt.s32.totalorder %s142_s30, %s142_s30 }
  0x22   : > { %p1945_p10 = scmp.lt.s32.totalorder %s1936_s7, %s1936_s7 }
  0x23   : > { %p1939_p9 = pnand %p1937_p11, %p1923_p0 }
  0x24   : > { %p1946_p13 = por %p1945_p10, %p1944_p5 }
  0x25   : > { %p1940_p6 = pneg %p1939_p9 }
  0x27   : > { %p1947_p1 = pnand %p1946_p13, %p1940_p6 }
  0x29   : > { %1950 = shalt.err (!%p1947_p1)
}
  0x2a   : > { %s2022_s8 = smov [#allocation5]   ;;  %p3055_p2 = scmp.ne.s32.totalorder %s3053_s24, 0 }
  0x2b   : > { %1865 = dma.vmem_to_smem (!%p2111_p12), %s142_s30, 16, %s2022_s8, [#allocation6]  }
  0x2c   : > { %162 = sbr.rel (%p3055_p2) target bundleno = 423 (0x1a7), region = 32 }
  0x31   : > { %p3056_p3 = scmp.eq.s32.totalorder %s2069_s16, 0 }
  0x33   : > { %1994 = dma.done.wait (%p3056_p3), [#allocation4], 16   ;;  %p3057_p4 = pmov %p3056_p3 }
  0x34   : > { %p3058_p9 = pmov %p3056_p3 }
  0x35   : > { %1996 = vsyncadd (%p3057_p4), [#allocation4], 4294967280 }
  0x36   : > { %1998 = dma.done.wait (%p3058_p9), [#allocation6], 16   ;;  %p3059_p5 = pmov %p3056_p3 }
  0x38   : > { %2000 = vsyncadd (%p3059_p5), [#allocation6], 4294967280 }
  0x39   : > { %172 = sfence }
  0x3a   : > { %p191_p6 = scmp.lt.s32.totalorder %s2069_s16, 1  ;;  %s1750_s9 = sld [smem:[#allocation2 + $0x1c]]  ;;  %vm309_vm0 = vcmask 1046528   ;;  %vm487_vm1 = vcmask 1045504   ;;  %vm1595_vm2 = vcmask 130048  }
  0x3b   : > { %s1749_s11 = sld [smem:[#allocation2 + $0x1]]  ;;  %s2023_s27 = smov 127  }
  0x3c   : > { %s192_s10 = scalar_select %p191_p6, %s2069_s16, 1 }
  0x3d   : > { %s1751_s19 = sld [smem:[#allocation2 + $0x37]]  ;;  %s2024_s6 = smov 126  }
  0x3e   : > { %s1847_s17 = smul.u32 72, %s192_s10  ;;  %s1752_s26 = sld [smem:[#allocation2 + $0x2]] }
  0x3f   : > { %s1753_s28 = sld [smem:[#allocation2 + $0x1d]]  ;;  %p3062_p12 = scmp.ne.s32.totalorder %s3051_s22, 0 }
  0x40   : > { %s2136_s25 = scalar_lea.vmem %s3046_s2, %s1847_s17  ;;  %v232_v2 = vstv %s1750_s9  ;;  %s1758_s29 = sld [smem:[#allocation2 + $0x4]] }
  0x41   : > { %v2139_v0 = vld [vmem:[%s2136_s25] sm:$0xff]  ;;  %v2142_v1 = vld [vmem:[%s2136_s25 + $0x8] sm:$0xff]  ;;  %v218_v4 = vstv %s1749_s11  ;;  %s2152_s30 = sld [smem:[#allocation2 + $0x38]]  ;;  %v2161_v15 = vld [vmem:[%s2136_s25 + $0x10] sm:$0x3] }
  0x42   : > { %v233_v3 = vmul.f32 %v232_v2, %v2139_v0  ;;  %v234_v5 = vmul.f32 %v232_v2, %v2142_v1  ;;  %v219_v6 = vmul.f32 %v218_v4, %v2139_v0  ;;  %v220_v8 = vmul.f32 %v218_v4, %v2142_v1  ;;  %s1759_s4 = sld [smem:[#allocation2 + $0x1f]] }
  0x43   : > { %v246_v7 = vstv %s1751_s19  ;;  %s1760_s5 = sld [smem:[#allocation2 + $0x3a]] }
  0x44   : > { %237 = vrot.lane.b32.xlu1 %v233_v3, %s2023_s27  ;;  %223 = vrot.lane.b32.xlu0 %v219_v6, %s2023_s27  ;;  %v248_v9 = vmul.f32 %v246_v7, %v2142_v1  ;;  %v260_v10 = vstv %s1752_s26  ;;  %v247_v11 = vmul.f32 %v246_v7, %v2139_v0  ;;  %s1761_s7 = sld [smem:[#allocation2 + $0x5]] }
  0x45   : > { %v262_v12 = vmul.f32 %v260_v10, %v2142_v1  ;;  %v274_v13 = vstv %s1753_s28  ;;  %v261_v14 = vmul.f32 %v260_v10, %v2139_v0  ;;  %s1762_s8 = sld [smem:[#allocation2 + $0x20]] }
  0x46   : > { %v354_v16 = vstv %s1758_s29  ;;  %v276_v17 = vmul.f32 %v274_v13, %v2142_v1  ;;  %v275_v22 = vmul.f32 %v274_v13, %v2139_v0  ;;  %s1763_s9 = sld [smem:[#allocation2 + $0x3b]] }
  0x47   : > { %v288_v18 = vstv %s2152_s30  ;;  %v356_v19 = vmul.f32 %v354_v16, %v2142_v1  ;;  %v357_v20 = vmul.f32 %v354_v16, %v2161_v15  ;;  %v355_v23 = vmul.f32 %v354_v16, %v2139_v0  ;;  %s1767_s10 = sld [smem:[#allocation2 + $0x7]] }
  0x48   : > { %239 = vrot.lane.b32.xlu1 %v234_v5, %s2023_s27  ;;  %225 = vrot.lane.b32.xlu0 %v220_v8, %s2023_s27  ;;  %v375_v21 = vstv %s1759_s4  ;;  %v290_v24 = vmul.f32 %v288_v18, %v2142_v1  ;;  %v289_v30 = vmul.f32 %v288_v18, %v2139_v0  ;;  %s1768_s11 = sld [smem:[#allocation2 + $0x22]] }
  0x49   : > { %v377_v25 = vmul.f32 %v375_v21, %v2142_v1  ;;  %v362_v26 = vrot.slane %v356_v19, 1  ;;  %v364_v27 = vrot.slane %v357_v20, 1  ;;  %v378_v28 = vmul.f32 %v375_v21, %v2161_v15  ;;  %s1769_s17 = sld [smem:[#allocation2 + $0x3d]] }
  0x4a   : > { %v396_v29 = vstv %s1760_s5  ;;  %v361_v31 = vrot.slane %v355_v23, 1  ;;  %v376_v32 = vmul.f32 %v375_v21, %v2139_v0  ;;  %v417_v38 = vstv %s1761_s7  ;;  %s1770_s19 = sld [smem:[#allocation2 + $0x8]] }
  0x4b   : > { %v398_v33 = vmul.f32 %v396_v29, %v2142_v1  ;;  %v399_v34 = vmul.f32 %v396_v29, %v2161_v15  ;;  %v365_v35 = vsel %vm309_vm0, %v362_v26, %v364_v27  ;;  %v383_v36 = vrot.slane %v377_v25, 1  ;;  %s1771_s20 = sld [smem:[#allocation2 + $0x23]] }
  0x4c   : > { %253 = vrot.lane.b32.xlu1 %v248_v9, %s2023_s27  ;;  %251 = vrot.lane.b32.xlu0 %v247_v11, %s2023_s27  ;;  %v385_v37 = vrot.slane %v378_v28, 1  ;;  %v363_v39 = vsel %vm309_vm0, %v361_v31, %v362_v26  ;;  %v382_v40 = vrot.slane %v376_v32, 1  ;;  %v397_v41 = vmul.f32 %v396_v29, %v2139_v0  ;;  %s1772_s24 = sld [smem:[#allocation2 + $0x3e]] }
  0x4d   : > { %v404_v42 = vrot.slane %v398_v33, 1  ;;  %v406_v43 = vrot.slane %v399_v34, 1  ;;  %v419_v45 = vmul.f32 %v417_v38, %v2142_v1  ;;  %v420_v46 = vmul.f32 %v417_v38, %v2161_v15  ;;  %s1779_s26 = sld [smem:[#allocation2 + $0xa]] }
  0x4e   : > { %v386_v44 = vsel %vm309_vm0, %v383_v36, %v385_v37  ;;  %v438_v47 = vstv %s1762_s8  ;;  %v384_v48 = vsel %vm309_vm0, %v382_v40, %v383_v36  ;;  %v403_v49 = vrot.slane %v397_v41, 1  ;;  %s1780_s28 = sld [smem:[#allocation2 + $0x25]] }
  0x4f   : > { %v418_v50 = vmul.f32 %v417_v38, %v2139_v0  ;;  %v407_v51 = vsel %vm309_vm0, %v404_v42, %v406_v43  ;;  %v459_v52 = vstv %s1763_s9  ;;  %v425_v53 = vrot.slane %v419_v45, 1  ;;  %s1781_s29 = sld [smem:[#allocation2 + $0x40]] }
  0x50   : > { %267 = vrot.lane.b32.xlu1 %v262_v12, %s2024_s6  ;;  %265 = vrot.lane.b32.xlu0 %v261_v14, %s2024_s6  ;;  %v427_v54 = vrot.slane %v420_v46, 1  ;;  %v440_v55 = vmul.f32 %v438_v47, %v2142_v1  ;;  %v441_v56 = vmul.f32 %v438_v47, %v2161_v15  ;;  %v405_v57 = vsel %vm309_vm0, %v403_v49, %v404_v42  ;;  %s1782_s30 = sld [smem:[#allocation2 + $0xb]] }
  0x51   : > { %v424_v58 = vrot.slane %v418_v50, 1  ;;  %v439_v59 = vmul.f32 %v438_v47, %v2139_v0  ;;  %v461_v60 = vmul.f32 %v459_v52, %v2142_v1  ;;  %v532_v61 = vstv %s1767_s10  ;;  %s1783_s4 = sld [smem:[#allocation2 + $0x26]] }
  0x52   : > { %v428_v62 = vsel %vm309_vm0, %v425_v53, %v427_v54  ;;  %v446_v63 = vrot.slane %v440_v55, 1  ;;  %v448_v2 = vrot.slane %v441_v56, 1  ;;  %v462_v3 = vmul.f32 %v459_v52, %v2161_v15  ;;  %s1788_s5 = sld [smem:[#allocation2 + $0xd]] }
  0x53   : > { %v426_v4 = vsel %vm309_vm0, %v424_v58, %v425_v53  ;;  %v445_v5 = vrot.slane %v439_v59, 1  ;;  %v460_v6 = vmul.f32 %v459_v52, %v2139_v0  ;;  %v534_v7 = vmul.f32 %v532_v61, %v2142_v1  ;;  %s2272_s7 = sld [smem:[#allocation2 + $0x41]] }
  0x54   : > { %281 = vrot.lane.b32.xlu1 %v276_v17, %s2024_s6  ;;  %279 = vrot.lane.b32.xlu0 %v275_v22, %s2024_s6  ;;  %v535_v8 = vmul.f32 %v532_v61, %v2161_v15  ;;  %v449_v9 = vsel %vm309_vm0, %v446_v63, %v448_v2  ;;  %v467_v10 = vrot.slane %v461_v60, 1  ;;  %v469_v11 = vrot.slane %v462_v3, 1  ;;  %s1789_s8 = sld [smem:[#allocation2 + $0x28]] }
  0x55   : > { %v553_v12 = vstv %s1768_s11  ;;  %v447_v13 = vsel %vm309_vm0, %v445_v5, %v446_v63  ;;  %v466_v14 = vrot.slane %v460_v6, 1  ;;  %v533_v16 = vmul.f32 %v532_v61, %v2139_v0  ;;  %v2255_v5 = vld [vmem:[%s2136_s25 + $0x20] sm:$0xff]  ;;  %s1790_s9 = sld [smem:[#allocation2 + $0x43]] }
  0x56   : > { %v540_v17 = vrot.slane %v534_v7, 2  ;;  %v542_v18 = vrot.slane %v535_v8, 2  ;;  %v470_v19 = vsel %vm309_vm0, %v467_v10, %v469_v11  ;;  %v555_v20 = vmul.f32 %v553_v12, %v2142_v1  ;;  %v2260_v8 = vld [vmem:[%s2136_s25 + $0x18] sm:$0xff]  ;;  %s1791_s10 = sld [smem:[#allocation2 + $0xe]] }
  0x57   : > { %v556_v21 = vmul.f32 %v553_v12, %v2161_v15  ;;  %v574_v22 = vstv %s1769_s17  ;;  %v468_v23 = vsel %vm309_vm0, %v466_v14, %v467_v10  ;;  %v554_v25 = vmul.f32 %v553_v12, %v2139_v0  ;;  %s1792_s11 = sld [smem:[#allocation2 + $0x29]] }
  0x58   : > { %295 = vrot.lane.b32.xlu1 %v290_v24, %s2024_s6  ;;  %293 = vrot.lane.b32.xlu0 %v289_v30, %s2024_s6  ;;  %v539_v24 = vrot.slane %v533_v16, 2  ;;  %v543_v26 = vsel %vm487_vm1, %v540_v17, %v542_v18  ;;  %v595_v27 = vstv %s1770_s19  ;;  %v561_v28 = vrot.slane %v555_v20, 2  ;;  %s1793_s17 = sld [smem:[#allocation2 + $0x44]] }
  0x59   : > { %v563_v29 = vrot.slane %v556_v21, 2  ;;  %v576_v30 = vmul.f32 %v574_v22, %v2142_v1  ;;  %v577_v31 = vmul.f32 %v574_v22, %v2161_v15  ;;  %v560_v33 = vrot.slane %v554_v25, 2  ;;  %s1797_s19 = sld [smem:[#allocation2 + $0x10]] }
  0x5a   : > { %v541_v32 = vsel %vm487_vm1, %v539_v24, %v540_v17  ;;  %v575_v34 = vmul.f32 %v574_v22, %v2139_v0  ;;  %v598_v36 = vmul.f32 %v595_v27, %v2161_v15  ;;  %v616_v40 = vstv %s1771_s20  ;;  %v2281_v22 = vld [vmem:[%s2136_s25 + $0x28] sm:$0x3]  ;;  %s1798_s20 = sld [smem:[#allocation2 + $0x2b]] }
  0x5b   : > { %v564_v37 = vsel %vm487_vm1, %v561_v28, %v563_v29  ;;  %v582_v38 = vrot.slane %v576_v30, 2  ;;  %v562_v41 = vsel %vm487_vm1, %v560_v33, %v561_v28  ;;  %v596_v43 = vmul.f32 %v595_v27, %v2139_v0 }
  0x5c   : > { %368 = vrot.lane.b32.xlu1 %v365_v35, %s2023_s27  ;;  %366 = vrot.lane.b32.xlu0 %v363_v39, %s2023_s27  ;;  %v597_v35 = vmul.f32 %v595_v27, %v2142_v1  ;;  %v584_v39 = vrot.slane %v577_v31, 2  ;;  %v581_v42 = vrot.slane %v575_v34, 2  ;;  %v605_v45 = vrot.slane %v598_v36, 2 }
  0x5d   : > { %v618_v47 = vmul.f32 %v616_v40, %v2142_v1  ;;  %v637_v49 = vstv %s1772_s24  ;;  %v617_v52 = vmul.f32 %v616_v40, %v2139_v0  ;;  %v680_v6 = vstv %s1779_s26  ;;  %s1799_s24 = sld [smem:[#allocation2 + $0x46]] }
  0x5e   : > { %v585_v46 = vsel %vm487_vm1, %v582_v38, %v584_v39  ;;  %v583_v50 = vsel %vm487_vm1, %v581_v42, %v582_v38  ;;  %v639_v56 = vmul.f32 %v637_v49, %v2142_v1  ;;  %v638_v60 = vmul.f32 %v637_v49, %v2139_v0  ;;  %s1800_s26 = sld [smem:[#allocation2 + $0x11]] }
  0x5f   : > { %v624_v54 = vrot.slane %v618_v47, 2  ;;  %v623_v59 = vrot.slane %v617_v52, 2  ;;  %v694_v10 = vstv %s1780_s28  ;;  %v681_v11 = vmul.f32 %v2260_v8, %v680_v6  ;;  %s1801_s28 = sld [smem:[#allocation2 + $0x2c]] }
  0x60   : > { %389 = vrot.lane.b32.xlu1 %v386_v44, %s2023_s27  ;;  %387 = vrot.lane.b32.xlu0 %v384_v48, %s2023_s27  ;;  %v603_v44 = vrot.slane %v597_v35, 2  ;;  %v619_v48 = vmul.f32 %v616_v40, %v2161_v15  ;;  %v644_v3 = vrot.slane %v638_v60, 2  ;;  %v696_v12 = vmul.f32 %v2255_v5, %v694_v10 }
  0x61   : > { %v625_v2 = vsel %vm487_vm1, %v623_v59, %v624_v54  ;;  %v695_v14 = vmul.f32 %v2260_v8, %v694_v10  ;;  %v722_v17 = vstv %s1782_s30  ;;  %v736_v20 = vstv %s1783_s4  ;;  %s2353_s30 = sld [smem:[#allocation2 + $0x1b]] }
  0x62   : > { %v606_v53 = vsel %vm487_vm1, %v603_v44, %v605_v45  ;;  %v626_v55 = vrot.slane %v619_v48, 2  ;;  %v723_v21 = vmul.f32 %v2260_v8, %v722_v17  ;;  %v738_v24 = vmul.f32 %v2255_v5, %v736_v20  ;;  %s1755_s4 = sld [smem:[#allocation2 + $0x3]] }
  0x63   : > { %v750_v25 = vstv %s2272_s7  ;;  %v836_v28 = vstv %s1789_s8  ;;  %v737_v29 = vmul.f32 %v2260_v8, %v736_v20  ;;  %v857_v36 = vstv %s1790_s9  ;;  %s2368_s7 = sld [smem:[#allocation2 + $0x1e]] }
  0x64   : > { %410 = vrot.lane.b32.xlu1 %v407_v51, %s2023_s27  ;;  %408 = vrot.lane.b32.xlu0 %v405_v57, %s2023_s27  ;;  %v602_v51 = vrot.slane %v596_v43, 2  ;;  %v640_v57 = vmul.f32 %v637_v49, %v2161_v15  ;;  %v627_v61 = vsel %vm487_vm1, %v624_v54, %v626_v55  ;;  %v752_v31 = vmul.f32 %v2255_v5, %v750_v25  ;;  %s2379_s8 = sld [smem:[#allocation2 + $0x39]] }
  0x65   : > { %v839_v35 = vmul.f32 %v2281_v22, %v836_v28  ;;  %v837_v39 = vmul.f32 %v2260_v8, %v836_v28  ;;  %v859_v40 = vmul.f32 %v2255_v5, %v857_v36  ;;  %v878_v45 = vstv %s1791_s10  ;;  %s2383_s9 = sld [smem:[#allocation2 + $0x36]] }
  0x66   : > { %v604_v58 = vsel %vm487_vm1, %v602_v51, %v603_v44  ;;  %v647_v63 = vrot.slane %v640_v57, 2  ;;  %v858_v48 = vmul.f32 %v2260_v8, %v857_v36  ;;  %v880_v51 = vmul.f32 %v2255_v5, %v878_v45  ;;  %s2391_s10 = sld [smem:[#allocation2 + $0x13]] }
  0x67   : > { %v846_v44 = vrot.slane %v839_v35, 1  ;;  %v843_v47 = vrot.slane %v837_v39, 1  ;;  %v865_v49 = vrot.slane %v859_v40, 1  ;;  %v899_v54 = vstv %s1792_s11  ;;  %s2401_s11 = sld [smem:[#allocation2 + $0x2e]] }
  0x68   : > { %431 = vrot.lane.b32.xlu1 %v428_v62, %s2024_s6  ;;  %429 = vrot.lane.b32.xlu0 %v426_v4, %s2024_s6  ;;  %v645_v62 = vrot.slane %v639_v56, 2  ;;  %v864_v56 = vrot.slane %v858_v48, 1  ;;  %v879_v57 = vmul.f32 %v2260_v8, %v878_v45  ;;  %v886_v59 = vrot.slane %v880_v51, 1 }
  0x6a   : > { %v648_v4 = vsel %vm487_vm1, %v645_v62, %v647_v63  ;;  %v646_v7 = vsel %vm487_vm1, %v644_v3, %v645_v62  ;;  %v902_v62 = vmul.f32 %v2281_v22, %v899_v54  ;;  %v920_v63 = vstv %s1793_s17  ;;  %s2409_s17 = sld [smem:[#allocation2 + $0x6]] }
  0x6b   : > { %v885_v3 = vrot.slane %v879_v57, 1 }
  0x6c   : > { %452 = vrot.lane.b32.xlu1 %v449_v9, %s2024_s6  ;;  %450 = vrot.lane.b32.xlu0 %v447_v13, %s2024_s6  ;;  %v682_v9 = vmul.f32 %v2255_v5, %v680_v6  ;;  %v708_v13 = vstv %s1781_s29  ;;  %v922_v6 = vmul.f32 %v2255_v5, %v920_v63  ;;  %s1802_s29 = sld [smem:[#allocation2 + $0x47]] }
  0x6d   : > { %v710_v16 = vmul.f32 %v2255_v5, %v708_v13  ;;  %v709_v18 = vmul.f32 %v2260_v8, %v708_v13  ;;  %v887_v13 = vsel %vm309_vm0, %v885_v3, %v886_v59 }
  0x70   : > { %473 = vrot.lane.b32.xlu1 %v470_v19, %s2024_s6  ;;  %471 = vrot.lane.b32.xlu0 %v468_v23, %s2024_s6  ;;  %v724_v19 = vmul.f32 %v2255_v5, %v722_v17  ;;  %v815_v23 = vstv %s1788_s5  ;;  %v928_v17 = vrot.slane %v922_v6, 1  ;;  %s2361_s5 = sld [smem:[#allocation2]] }
  0x71   : > { %v818_v27 = vmul.f32 %v2281_v22, %v815_v23  ;;  %v816_v30 = vmul.f32 %v2260_v8, %v815_v23 }
  0x73   : > { %v825_v34 = vrot.slane %v818_v27, 1  ;;  %v822_v38 = vrot.slane %v816_v30, 1 }
  0x74   : > { %546 = vrot.lane.b32.xlu1 %v543_v26, %s2023_s27  ;;  %544 = vrot.lane.b32.xlu0 %v541_v32, %s2023_s27  ;;  %v817_v26 = vmul.f32 %v2255_v5, %v815_v23  ;;  %v838_v32 = vmul.f32 %v2255_v5, %v836_v28  ;;  %v1013_v23 = vstv %s1798_s20  ;;  %v1034_v28 = vstv %s1799_s24  ;;  %s2426_s20 = sld [smem:[#allocation2 + $0x14]] }
  0x75   : > { %s2433_s24 = sld [smem:[#allocation2 + $0x2f]] }
  0x76   : > { %v823_v33 = vrot.slane %v817_v26, 1  ;;  %v844_v43 = vrot.slane %v838_v32, 1  ;;  %v1016_v32 = vmul.f32 %v2281_v22, %v1013_v23 }
  0x78   : > { %567 = vrot.lane.b32.xlu1 %v564_v37, %s2023_s27  ;;  %565 = vrot.lane.b32.xlu0 %v562_v41, %s2023_s27  ;;  %v751_v37 = vmul.f32 %v2260_v8, %v750_v25  ;;  %v860_v41 = vmul.f32 %v2281_v22, %v857_v36  ;;  %v826_v42 = vsel %vm309_vm0, %v823_v33, %v825_v34 }
  0x79   : > { %v847_v52 = vsel %vm309_vm0, %v844_v43, %v846_v44  ;;  %v845_v55 = vsel %vm309_vm0, %v843_v47, %v844_v43  ;;  %v1014_v36 = vmul.f32 %v2260_v8, %v1013_v23  ;;  %v1055_v44 = vstv %s1800_s26  ;;  %s2446_s26 = sld [smem:[#allocation2 + $0x4a]] }
  0x7a   : > { %v1035_v47 = vmul.f32 %v2260_v8, %v1034_v28 }
  0x7c   : > { %588 = vrot.lane.b32.xlu1 %v585_v46, %s2023_s27  ;;  %586 = vrot.lane.b32.xlu0 %v583_v50, %s2023_s27  ;;  %v824_v46 = vsel %vm309_vm0, %v822_v38, %v823_v33  ;;  %v867_v50 = vrot.slane %v860_v41, 1  ;;  %v1036_v38 = vmul.f32 %v2255_v5, %v1034_v28  ;;  %v1023_v41 = vrot.slane %v1016_v32, 2 }
  0x7d   : > { %v1041_v57 = vrot.slane %v1035_v47, 2 }
  0x80   : > { %609 = vrot.lane.b32.xlu1 %v606_v53, %s2024_s6  ;;  %607 = vrot.lane.b32.xlu0 %v604_v58, %s2024_s6  ;;  %v881_v53 = vmul.f32 %v2281_v22, %v878_v45  ;;  %v868_v58 = vsel %vm309_vm0, %v865_v49, %v867_v50  ;;  %v1076_v50 = vstv %s1801_s28  ;;  %s2453_s28 = sld [smem:[#allocation2 + $0x21]] }
  0x82   : > { %v888_v60 = vrot.slane %v881_v53, 1  ;;  %v1057_v53 = vmul.f32 %v2255_v5, %v1055_v44 }
  0x84   : > { %630 = vrot.lane.b32.xlu1 %v627_v61, %s2024_s6  ;;  %628 = vrot.lane.b32.xlu0 %v625_v2, %s2024_s6  ;;  %v901_v61 = vmul.f32 %v2255_v5, %v899_v54  ;;  %v866_v2 = vsel %vm309_vm0, %v864_v56, %v865_v49  ;;  %v1042_v49 = vrot.slane %v1036_v38, 2 }
  0x86   : > { %v907_v10 = vrot.slane %v901_v61, 1  ;;  %v1079_v61 = vmul.f32 %v2281_v22, %v1076_v50  ;;  %v1043_v6 = vsel %vm487_vm1, %v1041_v57, %v1042_v49 }
  0x88   : > { %651 = vrot.lane.b32.xlu1 %v648_v4, %s2024_s6  ;;  %649 = vrot.lane.b32.xlu0 %v646_v7, %s2024_s6  ;;  %v900_v4 = vmul.f32 %v2260_v8, %v899_v54  ;;  %v923_v7 = vmul.f32 %v2281_v22, %v920_v63  ;;  %v1058_v54 = vmul.f32 %v2281_v22, %v1055_v44 }
  0x8c   : > { %687 = vrot.lane.b32.xlu1 %v682_v9, %s2023_s27  ;;  %685 = vrot.lane.b32.xlu0 %v681_v11, %s2023_s27  ;;  %v889_v9 = vsel %vm309_vm0, %v886_v59, %v888_v60  ;;  %v909_v11 = vrot.slane %v902_v62, 1  ;;  %v1078_v60 = vmul.f32 %v2255_v5, %v1076_v50 }
  0x90   : > { %701 = vrot.lane.b32.xlu1 %v696_v12, %s2023_s27  ;;  %699 = vrot.lane.b32.xlu0 %v695_v14, %s2023_s27  ;;  %v992_v12 = vstv %s1797_s19  ;;  %v906_v14 = vrot.slane %v900_v4, 1  ;;  %v1097_v4 = vstv %s1802_s29  ;;  %s2415_s19 = sld [smem:[#allocation2 + $0x49]] }
  0x91   : > { %v994_v20 = vmul.f32 %v2255_v5, %v992_v12  ;;  %v993_v26 = vmul.f32 %v2260_v8, %v992_v12  ;;  %s2463_s29 = sld [smem:[#allocation2 + $0x16]] }
  0x93   : > { %v999_v35 = vrot.slane %v993_v26, 2 }
  0x94   : > { %715 = vrot.lane.b32.xlu1 %v710_v16, %s2023_s27  ;;  %713 = vrot.lane.b32.xlu0 %v709_v18, %s2023_s27  ;;  %v921_v16 = vmul.f32 %v2260_v8, %v920_v63  ;;  %v930_v18 = vrot.slane %v923_v7, 1  ;;  %v1063_v63 = vrot.slane %v1057_v53, 2  ;;  %v2441_v53 = vld [vmem:[%s2136_s25 + $0x38] sm:$0xff] }
  0x96   : > { %v927_v25 = vrot.slane %v921_v16, 1  ;;  %v931_v27 = vsel %vm309_vm0, %v928_v17, %v930_v18  ;;  %v1099_v16 = vmul.f32 %v2255_v5, %v1097_v4  ;;  %v206_v18 = vstv %s2353_s30  ;;  %s2514_s30 = sld [smem:[#allocation2 + $0x3c]] }
  0x98   : > { %729 = vrot.lane.b32.xlu1 %v724_v19, %s2024_s6  ;;  %727 = vrot.lane.b32.xlu0 %v723_v21, %s2024_s6  ;;  %v910_v19 = vsel %vm309_vm0, %v907_v10, %v909_v11  ;;  %v995_v21 = vmul.f32 %v2281_v22, %v992_v12  ;;  %v929_v34 = vsel %vm309_vm0, %v927_v25, %v928_v17  ;;  %v1084_v11 = vrot.slane %v1078_v60, 2 }
  0x99   : > { %v1086_v12 = vrot.slane %v1079_v61, 2  ;;  %v1100_v17 = vmul.f32 %v2281_v22, %v1097_v4  ;;  %v320_v25 = vstv %s2368_s7  ;;  %v1105_v32 = vrot.slane %v1099_v16, 2  ;;  %s2583_s7 = sld [smem:[#allocation2 + $0x17]] }
  0x9a   : > { %v1002_v30 = vrot.slane %v995_v21, 2  ;;  %v322_v38 = vmul.f32 %v320_v25, %v2142_v1  ;;  %v480_v16 = vstv %s2409_s17  ;;  %s2639_s17 = sld [smem:[#allocation2 + $0x24]] }
  0x9c   : > { %743 = vrot.lane.b32.xlu1 %v738_v24, %s2024_s6  ;;  %741 = vrot.lane.b32.xlu0 %v737_v29, %s2024_s6  ;;  %v908_v24 = vsel %vm309_vm0, %v906_v14, %v907_v10  ;;  %v1000_v29 = vrot.slane %v994_v20, 2  ;;  %v302_v14 = vstv %s1755_s4  ;;  %v328_v61 = vrot.slane %v322_v38, 1  ;;  %s2528_s4 = sld [smem:[#allocation2 + $0x31]] }
  0x9e   : > { %v1003_v39 = vsel %vm487_vm1, %v1000_v29, %v1002_v30  ;;  %v1001_v45 = vsel %vm487_vm1, %v999_v35, %v1000_v29  ;;  %v303_v29 = vmul.f32 %v302_v14, %v2139_v0  ;;  %v2412_v30 = vmul.f32 %v206_v18, %v2139_v0 }
  0xa0   : > { %757 = vrot.lane.b32.xlu1 %v752_v31, %s2024_s6  ;;  %755 = vrot.lane.b32.xlu0 %v751_v37, %s2024_s6  ;;  %v1015_v31 = vmul.f32 %v2255_v5, %v1013_v23 }
  0xa2   : > { %v1021_v40 = vrot.slane %v1015_v31, 2  ;;  %v1087_v31 = vsel %vm487_vm1, %v1084_v11, %v1086_v12 }
  0xa4   : > { %829 = vrot.lane.b32.xlu1 %v826_v42, %s2023_s27  ;;  %827 = vrot.lane.b32.xlu0 %v824_v46, %s2023_s27  ;;  %v1037_v42 = vmul.f32 %v2281_v22, %v1034_v28  ;;  %v1020_v46 = vrot.slane %v1014_v36, 2  ;;  %v1024_v51 = vsel %vm487_vm1, %v1021_v40, %v1023_v41  ;;  %v305_v28 = vmul.f32 %v302_v14, %v2161_v15 }
  0xa5   : > { %v2429_v41 = vmul.f32 %v206_v18, %v2142_v1 }
  0xa6   : > { %v1022_v56 = vsel %vm487_vm1, %v1020_v46, %v1021_v40  ;;  %v337_v40 = vstv %s2379_s8  ;;  %v212_v46 = vstv %s2383_s9  ;;  %s2605_s8 = sld [smem:[#allocation2 + $0x32]] }
  0xa7   : > { %v340_v57 = vmul.f32 %v337_v40, %v2161_v15  ;;  %s2615_s9 = sld [smem:[#allocation2 + $0x4d]] }
  0xa8   : > { %850 = vrot.lane.b32.xlu1 %v847_v52, %s2023_s27  ;;  %848 = vrot.lane.b32.xlu0 %v845_v55, %s2023_s27  ;;  %v1044_v52 = vrot.slane %v1037_v42, 2 }
  0xa9   : > { %v347_v18 = vrot.slane %v340_v57, 1  ;;  %v498_v57 = vstv %s2453_s28  ;;  %s2681_s28 = sld [smem:[#allocation2 + $0x35]] }
  0xaa   : > { %v1045_v62 = vsel %vm487_vm1, %v1042_v49, %v1044_v52 }
  0xac   : > { %871 = vrot.lane.b32.xlu1 %v868_v58, %s2023_s27  ;;  %869 = vrot.lane.b32.xlu0 %v866_v2, %s2023_s27  ;;  %v1056_v58 = vmul.f32 %v2260_v8, %v1055_v44  ;;  %v1065_v2 = vrot.slane %v1058_v54, 2  ;;  %v1140_v54 = vstv %s2391_s10  ;;  %s2623_s10 = sld [smem:[#allocation2 + $0x9]] }
  0xae   : > { %v1062_v7 = vrot.slane %v1056_v58, 2 }
  0xb0   : > { %892 = vrot.lane.b32.xlu1 %v889_v9, %s2024_s6  ;;  %890 = vrot.lane.b32.xlu0 %v887_v13, %s2024_s6  ;;  %v1077_v9 = vmul.f32 %v2260_v8, %v1076_v50  ;;  %v1066_v13 = vsel %vm487_vm1, %v1063_v63, %v1065_v2  ;;  %v1064_v21 = vsel %vm487_vm1, %v1062_v7, %v1063_v63  ;;  %v313_v50 = vrot.slane %v305_v28, 1 }
  0xb1   : > { %v338_v63 = vmul.f32 %v337_v40, %v2139_v0  ;;  %v214_v2 = vmul.f32 %v212_v46, %v2142_v1  ;;  %v1182_v28 = vstv %s2426_s20  ;;  %s2648_s20 = sld [smem:[#allocation2 + $0x3f]] }
  0xb2   : > { %v1083_v23 = vrot.slane %v1077_v9, 2  ;;  %v2461_v9 = vld [vmem:[%s2136_s25 + $0x30] sm:$0xff] }
  0xb4   : > { %913 = vrot.lane.b32.xlu1 %v910_v19, %s2024_s6  ;;  %911 = vrot.lane.b32.xlu0 %v908_v24, %s2024_s6  ;;  %v200_v19 = vstv %s2361_s5  ;;  %v1098_v24 = vmul.f32 %v2260_v8, %v1097_v4  ;;  %v1085_v42 = vsel %vm487_vm1, %v1083_v23, %v1084_v11  ;;  %v2457_v4 = vmul.f32 %v212_v46, %v2139_v0  ;;  %s2565_s5 = sld [smem:[#allocation2 + $0x4c]] }
  0xb5   : > { %v2418_v35 = vmul.f32 %v200_v19, %v2139_v0  ;;  %v202_v58 = vmul.f32 %v200_v19, %v2142_v1  ;;  %v1154_v19 = vstv %s2401_s11  ;;  %s2631_s11 = sld [smem:[#allocation2 + $0x19]] }
  0xb6   : > { %v2338_v33 = vpop.permute.xlu1 %237  ;;  %v2342_v37 = vpop.permute.xlu0 %223  ;;  %v1104_v44 = vrot.slane %v1098_v24, 2 }
  0xb8   : > { %934 = vrot.lane.b32.xlu1 %v931_v27, %s2024_s6  ;;  %932 = vrot.lane.b32.xlu0 %v929_v34, %s2024_s6  ;;  %v304_v27 = vmul.f32 %v302_v14, %v2142_v1  ;;  %v1107_v34 = vrot.slane %v1100_v17, 2  ;;  %v1142_v14 = vmul.f32 %v2441_v53, %v1140_v54 }
  0xba   : > { %v2349_v43 = vpop.permute.xlu1 %239  ;;  %v2355_v48 = vpop.permute.xlu0 %225  ;;  %v311_v49 = vrot.slane %v304_v27, 1  ;;  %v1108_v52 = vsel %vm487_vm1, %v1105_v32, %v1107_v34  ;;  %v344_v27 = vrot.slane %v338_v63, 1  ;;  %v483_v34 = vmul.f32 %v480_v16, %v2161_v15 }
  0xbc   : > { %1006 = vrot.lane.b32.xlu1 %v1003_v39, %s2023_s27  ;;  %1004 = vrot.lane.b32.xlu0 %v1001_v45, %s2023_s27  ;;  %v323_v39 = vmul.f32 %v320_v25, %v2161_v15  ;;  %v321_v45 = vmul.f32 %v320_v25, %v2139_v0  ;;  %v2466_v11 = vsel %vm309_vm0, %v311_v49, %v313_v50  ;;  %v1210_v50 = vstv %s2446_s26  ;;  %s2666_s26 = sld [smem:[#allocation2 + $0x1a]] }
  0xbd   : > { %v1141_v25 = vmul.f32 %v2461_v9, %v1140_v54  ;;  %v2506_v54 = vmul.f32 %v2461_v9, %v1182_v28  ;;  %v491_v63 = vrot.slane %v483_v34, 2 }
  0xbe   : > { %v2364_v55 = vpop.permute.xlu1 %253  ;;  %v2370_v59 = vpop.permute.xlu0 %251  ;;  %v327_v7 = vrot.slane %v321_v45, 1 }
  0xc0   : > { %1027 = vrot.lane.b32.xlu1 %v1024_v51, %s2023_s27  ;;  %1025 = vrot.lane.b32.xlu0 %v1022_v56, %s2023_s27  ;;  %v310_v51 = vrot.slane %v303_v29, 1  ;;  %v339_v56 = vmul.f32 %v337_v40, %v2142_v1  ;;  %v2487_v29 = vsel %vm309_vm0, %v327_v7, %v328_v61  ;;  %v1155_v40 = vmul.f32 %v2461_v9, %v1154_v19 }
  0xc2   : > { %v2377_v3 = vpop.permute.xlu1 %267  ;;  %v2385_v10 = vpop.permute.xlu0 %265  ;;  %v2469_v12 = vsel %vm309_vm0, %v310_v51, %v311_v49  ;;  %v345_v17 = vrot.slane %v339_v56, 1  ;;  %v1184_v49 = vmul.f32 %v2441_v53, %v1182_v28 }
  0xc4   : > { %1048 = vrot.lane.b32.xlu1 %v1045_v62, %s2023_s27  ;;  %1046 = vrot.lane.b32.xlu0 %v1043_v6, %s2023_s27  ;;  %v330_v62 = vrot.slane %v323_v39, 1  ;;  %v1106_v6 = vsel %vm487_vm1, %v1104_v44, %v1105_v32  ;;  %v482_v32 = vmul.f32 %v480_v16, %v2142_v1  ;;  %v1156_v39 = vmul.f32 %v2441_v53, %v1154_v19 }
  0xc5   : > { %v481_v44 = vmul.f32 %v480_v16, %v2139_v0  ;;  %v348_v45 = vsel %vm309_vm0, %v345_v17, %v347_v18  ;;  %v2526_v18 = vmul.f32 %v2461_v9, %v1210_v50 }
  0xc6   : > { %v2396_v20 = vpop.permute.xlu1 %281  ;;  %v2403_v26 = vpop.permute.xlu0 %279  ;;  %v2480_v23 = vsel %vm309_vm0, %v328_v61, %v330_v62  ;;  %v230_v61 = vadd.f32 %v2355_v48, %v202_v58  ;;  %v489_v62 = vrot.slane %v482_v32, 2  ;;  %v229_v48 = vadd.f32 %v2342_v37, %v2418_v35 }
  0xc7   : > { %v488_v16 = vrot.slane %v481_v44, 2  ;;  %v258_v58 = vadd.f32 %v2364_v55, %v214_v2  ;;  %v2545_v32 = vmul.f32 %v498_v57, %v2139_v0  ;;  %v243_v35 = vadd.f32 %v2338_v33, %v2412_v30 }
  0xc8   : > { %1069 = vrot.lane.b32.xlu1 %v1066_v13, %s2024_s6  ;;  %1067 = vrot.lane.b32.xlu0 %v1064_v21, %s2024_s6  ;;  %v1168_v21 = vstv %s2415_s19  ;;  %v272_v19 = vadd.f32 %v2377_v3, %v230_v61  ;;  %v271_v55 = vadd.f32 %v2385_v10, %v229_v48  ;;  %v515_v44 = vstv %s2514_s30  ;;  %s2644_s19 = sld [smem:[#allocation2 + $0x34]] }
  0xc9   : > { %v1169_v46 = vmul.f32 %v2461_v9, %v1168_v21  ;;  %v490_v33 = vsel %vm487_vm1, %v488_v16, %v489_v62  ;;  %v285_v30 = vadd.f32 %v2403_v26, %v243_v35  ;;  %v1296_v61 = vstv %s2528_s4  ;;  %v1914_v48 = vld [vmem:[%s2136_s25] sm:$0xff]  ;;  %s2700_s30 = sld [smem:[#allocation2 + $0x50]] }
  0xca   : > { %v2421_v36 = vpop.permute.xlu1 %295  ;;  %v2436_v47 = vpop.permute.xlu0 %293  ;;  %v518_v16 = vmul.f32 %v515_v44, %v2161_v15  ;;  %s2704_s4 = sld [smem:[#allocation2 + $0x27]] }
  0xcb   : > { %v300_v3 = vadd.f32 %v2421_v36, %v258_v58  ;;  %v318_v36 = vadd.f32 %v2466_v11, %v272_v19  ;;  %v516_v58 = vmul.f32 %v1914_v48, %v515_v44 }
  0xcc   : > { %1090 = vrot.lane.b32.xlu1 %v1087_v31, %s2024_s6  ;;  %1088 = vrot.lane.b32.xlu0 %v1085_v42, %s2024_s6  ;;  %v1196_v31 = vstv %s2433_s24  ;;  %v1170_v42 = vmul.f32 %v2441_v53, %v1168_v21  ;;  %v2535_v21 = vmul.f32 %v498_v57, %v2142_v1  ;;  %v257_v1 = vadd.f32 %v2370_v59, %v2457_v4  ;;  %s2657_s24 = sld [smem:[#allocation2 + $0x4f]] }
  0xcd   : > { %v2509_v56 = vmul.f32 %v2441_v53, %v1196_v31  ;;  %v352_v11 = vadd.f32 %v348_v45, %v300_v3  ;;  %v1297_v3 = vmul.f32 %v2461_v9, %v1296_v61 }
  0xce   : > { %v2450_v60 = vpop.permute.xlu1 %368  ;;  %v2471_v13 = vpop.permute.xlu0 %366  ;;  %v299_v10 = vadd.f32 %v2436_v47, %v257_v1  ;;  %v317_v47 = vadd.f32 %v2469_v12, %v271_v55  ;;  %v525_v55 = vrot.slane %v518_v16, 2 }
  0xd0   : > { %1111 = vrot.lane.b32.xlu1 %v1108_v52, %s2024_s6  ;;  %1109 = vrot.lane.b32.xlu0 %v1106_v6, %s2024_s6  ;;  %v346_v52 = vsel %vm309_vm0, %v344_v27, %v345_v17  ;;  %v1275_v6 = vstv %s2463_s29  ;;  %v2523_v17 = vmul.f32 %v2441_v53, %v1210_v50  ;;  %v244_v27 = vadd.f32 %v2349_v43, %v2429_v41  ;;  %s2684_s29 = sld [smem:[#allocation2 + $0xc]] }
  0xd1   : > { %v2548_v37 = vmul.f32 %v2441_v53, %v1275_v6  ;;  %v492_v43 = vsel %vm487_vm1, %v489_v62, %v491_v63  ;;  %v2563_v59 = vmul.f32 %v2461_v9, %v1275_v6  ;;  %v351_v12 = vadd.f32 %v346_v52, %v299_v10 }
  0xd2   : > { %v2482_v24 = vpop.permute.xlu1 %389  ;;  %v2492_v38 = vpop.permute.xlu0 %387  ;;  %v286_v41 = vadd.f32 %v2396_v20, %v244_v27  ;;  %v506_v20 = vrot.slane %v2535_v21, 2  ;;  %v334_v63 = vadd.f32 %v2487_v29, %v285_v30  ;;  %v1338_v10 = vstv %s2583_s7  ;;  %s2763_s7 = sld [smem:[#allocation2 + $0xf]] }
  0xd4   : > { %1147 = vrot.lane.b32.xlu1 %v1142_v14, %s2023_s27  ;;  %1145 = vrot.lane.b32.xlu0 %v1141_v25, %s2023_s27  ;;  %v2520_v14 = vmul.f32 %v2461_v9, %v1196_v31  ;;  %v2538_v25 = vld [vmem:[%s2136_s25 + $0x40] sm:$0x3]  ;;  %v501_v31 = vmul.f32 %v498_v57, %v2161_v15  ;;  %v335_v50 = vadd.f32 %v2480_v23, %v286_v41 }
  0xd5   : > { %v2560_v0 = vmul.f32 %v2538_v25, %v1275_v6  ;;  %v1299_v27 = vmul.f32 %v2538_v25, %v1296_v61  ;;  %v393_v15 = vadd.f32 %v2492_v38, %v334_v63  ;;  %v522_v38 = vrot.slane %v516_v58, 2 }
  0xd6   : > { %v411_v51 = vpop.permute.xlu1 %410  ;;  %v2516_v7 = vpop.permute.xlu0 %408  ;;  %v508_v34 = vrot.slane %v501_v31, 2  ;;  %v394_v19 = vadd.f32 %v2482_v24, %v335_v50 }
  0xd7   : > { %v1285_v26 = vrot.slane %v2560_v0, 1  ;;  %v415_v62 = vadd.f32 %v411_v51, %v352_v11 }
  0xd8   : > { %1161 = vrot.lane.b32.xlu1 %v1156_v39, %s2023_s27  ;;  %1159 = vrot.lane.b32.xlu0 %v1155_v40, %s2023_s27  ;;  %v505_v39 = vrot.slane %v2545_v32, 2  ;;  %v1283_v40 = vrot.slane %v2548_v37, 1  ;;  %v509_v29 = vsel %vm487_vm1, %v506_v20, %v508_v34  ;;  %v1340_v37 = vmul.f32 %v2441_v53, %v1338_v10 }
  0xda   : > { %v432_v28 = vpop.permute.xlu1 %431  ;;  %v430_v2 = vpop.permute.xlu0 %429  ;;  %v507_v1 = vsel %vm487_vm1, %v505_v39, %v506_v20  ;;  %v1303_v39 = vrot.slane %v1297_v3, 1  ;;  %v1346_v48 = vrot.slane %v1340_v37, 1  ;;  %v1452_v3 = vstv %s2631_s11  ;;  %s2850_s11 = sld [smem:[#allocation2 + $0x2d]] }
  0xdc   : > { %1175 = vrot.lane.b32.xlu1 %v1170_v42, %s2023_s27  ;;  %1173 = vrot.lane.b32.xlu0 %v1169_v46, %s2023_s27  ;;  %v373_v42 = vadd.f32 %v2450_v60, %v318_v36  ;;  %v1282_v46 = vrot.slane %v2563_v59, 1  ;;  %v372_v60 = vadd.f32 %v2471_v13, %v317_v47  ;;  %v414_v13 = vadd.f32 %v2516_v7, %v351_v12 }
  0xdd   : > { %v1359_v12 = vstv %s2605_s8  ;;  %s1795_s8 = sld [smem:[#allocation2 + $0x2a]] }
  0xde   : > { %v453_v4 = vpop.permute.xlu1 %452  ;;  %v451_v57 = vpop.permute.xlu0 %450  ;;  %v436_v45 = vadd.f32 %v432_v28, %v373_v42  ;;  %v435_v51 = vadd.f32 %v430_v2, %v372_v60  ;;  %v1317_v28 = vstv %s2565_s5  ;;  %s2713_s5 = sld [smem:[#allocation2 + $0x42]] }
  0xdf   : > { %v457_v31 = vadd.f32 %v453_v4, %v394_v19  ;;  %v456_v35 = vadd.f32 %v451_v57, %v393_v15  ;;  %v1320_v59 = vmul.f32 %v2538_v25, %v1317_v28  ;;  %v1306_v4 = vrot.slane %v1299_v27, 1 }
  0xe0   : > { %1189 = vrot.lane.b32.xlu1 %v1184_v49, %s2024_s6  ;;  %1187 = vrot.lane.b32.xlu0 %v2506_v54, %s2024_s6  ;;  %v1913_v49 = vld [vmem:[%s2136_s25 + $0x8] sm:$0xff]  ;;  %v1298_v54 = vmul.f32 %v2441_v53, %v1296_v61  ;;  %v496_v24 = vadd.f32 %v492_v43, %v436_v45  ;;  %v495_v2 = vadd.f32 %v490_v33, %v435_v51 }
  0xe1   : > { %v517_v6 = vmul.f32 %v1913_v49, %v515_v44  ;;  %v1319_v43 = vmul.f32 %v2441_v53, %v1317_v28  ;;  %v513_v20 = vadd.f32 %v509_v29, %v457_v31  ;;  %v512_v47 = vadd.f32 %v507_v1, %v456_v35 }
  0xe2   : > { %v474_v23 = vpop.permute.xlu1 %473  ;;  %v472_v21 = vpop.permute.xlu0 %471  ;;  %v1304_v30 = vrot.slane %v1298_v54, 1  ;;  %v1318_v44 = vmul.f32 %v2461_v9, %v1317_v28  ;;  %v1327_v57 = vrot.slane %v1320_v59, 1  ;;  %v1339_v49 = vmul.f32 %v2461_v9, %v1338_v10 }
  0xe3   : > { %v478_v52 = vadd.f32 %v474_v23, %v415_v62  ;;  %v477_v32 = vadd.f32 %v472_v21, %v414_v13  ;;  %v1361_v13 = vmul.f32 %v2441_v53, %v1359_v12  ;;  %v1362_v51 = vmul.f32 %v2538_v25, %v1359_v12 }
  0xe4   : > { %1203 = vrot.lane.b32.xlu1 %v2509_v56, %s2024_s6  ;;  %1201 = vrot.lane.b32.xlu0 %v2520_v14, %s2024_s6  ;;  %v523_v56 = vrot.slane %v517_v6, 2  ;;  %v1286_v14 = vsel %vm309_vm0, %v1283_v40, %v1285_v26  ;;  %v1307_v61 = vsel %vm309_vm0, %v1304_v30, %v1306_v4  ;;  %v1305_v62 = vsel %vm309_vm0, %v1303_v39, %v1304_v30 }
  0xe5   : > { %v1324_v23 = vrot.slane %v1318_v44, 1  ;;  %v662_v29 = vstv %s2623_s10  ;;  %v1345_v28 = vrot.slane %v1339_v49, 1  ;;  %v1360_v15 = vmul.f32 %v2461_v9, %v1359_v12  ;;  %s1806_s10 = sld [smem:[#allocation2 + $0x12]] }
  0xe6   : > { %v547_v7 = vpop.permute.xlu1 %546  ;;  %v545_v0 = vpop.permute.xlu0 %544  ;;  %v526_v34 = vsel %vm487_vm1, %v523_v56, %v525_v55  ;;  %v524_v11 = vsel %vm487_vm1, %v522_v38, %v523_v56  ;;  %v1367_v56 = vrot.slane %v1361_v13, 1  ;;  %v1369_v55 = vrot.slane %v1362_v51, 1 }
  0xe7   : > { %v551_v41 = vadd.f32 %v547_v7, %v496_v24  ;;  %v550_v36 = vadd.f32 %v545_v0, %v495_v2  ;;  %v529_v63 = vadd.f32 %v524_v11, %v477_v32  ;;  %v1347_v38 = vsel %vm309_vm0, %v1345_v28, %v1346_v48 }
  0xe8   : > { %1217 = vrot.lane.b32.xlu1 %v2523_v17, %s2024_s6  ;;  %1215 = vrot.lane.b32.xlu0 %v2526_v18, %s2024_s6  ;;  %v1284_v17 = vsel %vm309_vm0, %v1282_v46, %v1283_v40  ;;  %v1325_v18 = vrot.slane %v1319_v43, 1  ;;  %v1341_v40 = vmul.f32 %v2538_v25, %v1338_v10  ;;  %v530_v46 = vadd.f32 %v526_v34, %v478_v52 }
  0xe9   : > { %v1380_v52 = vstv %s2615_s9  ;;  %v1366_v0 = vrot.slane %v1360_v15, 1  ;;  %v1370_v4 = vsel %vm309_vm0, %v1367_v56, %v1369_v55  ;;  %v663_v39 = vmul.f32 %v2260_v8, %v662_v29  ;;  %s1816_s9 = sld [smem:[#allocation2 + $0x30]] }
  0xea   : > { %v568_v33 = vpop.permute.xlu1 %567  ;;  %v566_v50 = vpop.permute.xlu0 %565  ;;  %v1328_v16 = vsel %vm309_vm0, %v1325_v18, %v1327_v57  ;;  %v1348_v58 = vrot.slane %v1341_v40, 1  ;;  %v1326_v27 = vsel %vm309_vm0, %v1324_v23, %v1325_v18  ;;  %v1382_v24 = vmul.f32 %v2441_v53, %v1380_v52 }
  0xeb   : > { %v572_v42 = vadd.f32 %v568_v33, %v513_v20  ;;  %v571_v26 = vadd.f32 %v566_v50, %v512_v47  ;;  %v1383_v7 = vmul.f32 %v2538_v25, %v1380_v52  ;;  %v1454_v20 = vmul.f32 %v2441_v53, %v1452_v3 }
  0xec   : > { %1289 = vrot.lane.b32.xlu1 %v1286_v14, %s2023_s27  ;;  %1287 = vrot.lane.b32.xlu0 %v1284_v17, %s2023_s27  ;;  %v1349_v32 = vsel %vm309_vm0, %v1346_v48, %v1348_v58  ;;  %v1381_v14 = vmul.f32 %v2461_v9, %v1380_v52  ;;  %v1388_v59 = vrot.slane %v1382_v24, 1  ;;  %v1455_v33 = vmul.f32 %v2538_v25, %v1452_v3 }
  0xed   : > { %v1390_v10 = vrot.slane %v1383_v7, 1  ;;  %v1473_v17 = vstv %s2644_s19  ;;  %v674_v47 = vstv %s2648_s20  ;;  %v1368_v44 = vsel %vm309_vm0, %v1366_v0, %v1367_v56  ;;  %s1817_s19 = sld [smem:[#allocation2 + $0x4b]] }
  0xee   : > { %v589_v60 = vpop.permute.xlu1 %588  ;;  %v587_v6 = vpop.permute.xlu0 %586  ;;  %v1387_v50 = vrot.slane %v1381_v14, 1  ;;  %v1460_v40 = vrot.slane %v1454_v20, 2  ;;  %v1494_v12 = vstv %s2657_s24  ;;  %v1474_v49 = vmul.f32 %v2461_v9, %v1473_v17  ;;  %s1824_s20 = sld [smem:[#allocation2 + $0x18]] }
  0xef   : > { %v593_v45 = vadd.f32 %v589_v60, %v530_v46  ;;  %v592_v19 = vadd.f32 %v587_v6, %v529_v63  ;;  %v1391_v37 = vsel %vm309_vm0, %v1388_v59, %v1390_v10  ;;  %v1476_v46 = vmul.f32 %v2538_v25, %v1473_v17  ;;  %s2875_s24 = sld [smem:[#allocation2 + $0x33]] }
  0xf0   : > { %1310 = vrot.lane.b32.xlu1 %v1307_v61, %s2023_s27  ;;  %1308 = vrot.lane.b32.xlu0 %v1305_v62, %s2023_s27  ;;  %v1462_v62 = vrot.slane %v1455_v33, 2  ;;  %v1389_v48 = vsel %vm309_vm0, %v1387_v50, %v1388_v59  ;;  %v676_v58 = vmul.f32 %v2255_v5, %v674_v47  ;;  %v1496_v52 = vmul.f32 %v2441_v53, %v1494_v12 }
  0xf1   : > { %v1483_v51 = vrot.slane %v1476_v46, 2  ;;  %v1497_v28 = vmul.f32 %v2538_v25, %v1494_v12  ;;  %v1495_v24 = vmul.f32 %v2461_v9, %v1494_v12  ;;  %v764_v14 = vstv %s2684_s29  ;;  %s188_s29 = sand.u32 1, %s2011_s13  }
  0xf2   : > { %v610_v21 = vpop.permute.xlu1 %609  ;;  %v608_v31 = vpop.permute.xlu0 %607  ;;  %v767_v50 = vmul.f32 %v2281_v22, %v764_v14 }
  0xf3   : > { %v614_v54 = vadd.f32 %v610_v21, %v551_v41  ;;  %v613_v1 = vadd.f32 %v608_v31, %v550_v36  ;;  %v664_v41 = vmul.f32 %v2255_v5, %v662_v29  ;;  %v668_v36 = vstv %s2639_s17  ;;  %s2852_s17 = sld [smem:[#allocation2 + $0x48]] }
  0xf4   : > { %1331 = vrot.lane.b32.xlu1 %v1328_v16, %s2023_s27  ;;  %1329 = vrot.lane.b32.xlu0 %v1326_v27, %s2023_s27  ;;  %v670_v18 = vmul.f32 %v2255_v5, %v668_v36  ;;  %v669_v63 = vmul.f32 %v2260_v8, %v668_v36  ;;  %v1515_v21 = vstv %s2666_s26  ;;  %v1463_v27 = vsel %vm487_vm1, %v1460_v40, %v1462_v62  ;;  %s2906_s26 = sld [smem:[#allocation2 + $0x4e]] }
  0xf5   : > { %v666_v60 = vadd.f32 %v664_v41, %v614_v54  ;;  %v665_v16 = vadd.f32 %v663_v39, %v613_v1  ;;  %v675_v31 = vmul.f32 %v2260_v8, %v674_v47  ;;  %v1517_v56 = vmul.f32 %v2441_v53, %v1515_v21 }
  0xf6   : > { %v631_v35 = vpop.permute.xlu1 %630  ;;  %v629_v43 = vpop.permute.xlu0 %628  ;;  %v1518_v55 = vmul.f32 %v2538_v25, %v1515_v21  ;;  %v1502_v8 = vrot.slane %v1496_v52, 2  ;;  %v1536_v41 = vstv %s2681_s28  ;;  %v1504_v0 = vrot.slane %v1497_v28, 2  ;;  %s2955_s28 = sld [smem:[#allocation5]] }
  0xf7   : > { %v635_v2 = vadd.f32 %v631_v35, %v572_v42  ;;  %v634_v30 = vadd.f32 %v629_v43, %v571_v26  ;;  %v1453_v42 = vmul.f32 %v2461_v9, %v1452_v3  ;;  %v1475_v26 = vmul.f32 %v2441_v53, %v1473_v17 }
  0xf8   : > { %1352 = vrot.lane.b32.xlu1 %v1349_v32, %s2024_s6  ;;  %1350 = vrot.lane.b32.xlu0 %v1347_v38, %s2024_s6  ;;  %v1480_v32 = vrot.slane %v1474_v49, 2  ;;  %v1501_v10 = vrot.slane %v1495_v24, 2  ;;  %v1516_v36 = vmul.f32 %v2461_v9, %v1515_v21  ;;  %v1525_v33 = vrot.slane %v1518_v55, 2 }
  0xf9   : > { %v1459_v23 = vrot.slane %v1453_v42, 2  ;;  %v1481_v13 = vrot.slane %v1475_v26, 2  ;;  %v672_v54 = vadd.f32 %v670_v18, %v635_v2  ;;  %v671_v1 = vadd.f32 %v669_v63, %v634_v30  ;;  %v2719_v42 = vld [vmem:[%s2136_s25 + $0x20] sm:$0xff]  ;;  %v2732_v63 = vld [vmem:[%s2136_s25 + $0x18] sm:$0xff] }
  0xfa   : > { %v652_v34 = vpop.permute.xlu1 %651  ;;  %v650_v57 = vpop.permute.xlu0 %649  ;;  %v1539_v39 = vmul.f32 %v2538_v25, %v1536_v41  ;;  %v766_v47 = vmul.f32 %v2719_v42, %v764_v14 }
  0xfb   : > { %v656_v11 = vadd.f32 %v652_v34, %v593_v45  ;;  %v655_v61 = vadd.f32 %v650_v57, %v592_v19  ;;  %v1461_v5 = vsel %vm487_vm1, %v1459_v23, %v1460_v40  ;;  %v1484_v35 = vsel %vm487_vm1, %v1481_v13, %v1483_v51  ;;  %v2741_v51 = vld [vmem:[%s2136_s25 + $0x28] sm:$0x3] }
  0xfc   : > { %1373 = vrot.lane.b32.xlu1 %v1370_v4, %s2024_s6  ;;  %1371 = vrot.lane.b32.xlu0 %v1368_v44, %s2024_s6  ;;  %v1482_v59 = vsel %vm487_vm1, %v1480_v32, %v1481_v13  ;;  %v1523_v4 = vrot.slane %v1517_v56, 2  ;;  %v1538_v34 = vmul.f32 %v2441_v53, %v1536_v41  ;;  %v1505_v44 = vsel %vm487_vm1, %v1502_v8, %v1504_v0 }
  0xfd   : > { %v678_v38 = vadd.f32 %v676_v58, %v656_v11  ;;  %v677_v30 = vadd.f32 %v675_v31, %v655_v61  ;;  %v1503_v57 = vsel %vm487_vm1, %v1501_v10, %v1502_v8  ;;  %v1557_v40 = vstv %s2700_s30  ;;  %s1846_s30 = smul.u32 48, %s188_s29 }
  0xfe   : > { %v688_v45 = vpop.permute.xlu1 %687  ;;  %v686_v19 = vpop.permute.xlu0 %685  ;;  %v1526_v46 = vsel %vm487_vm1, %v1523_v4, %v1525_v33  ;;  %v1537_v61 = vmul.f32 %v2461_v9, %v1536_v41  ;;  %v1544_v12 = vrot.slane %v1538_v34, 2  ;;  %v772_v22 = vrot.slane %v766_v47, 1 }
  0xff   : > { %v692_v6 = vadd.f32 %v688_v45, %v666_v60  ;;  %v691_v29 = vadd.f32 %v686_v19, %v665_v16  ;;  %v781_v60 = vstv %s2704_s4  ;;  %v1546_v45 = vrot.slane %v1539_v39, 2  ;;  %s2979_s4 = sld [smem:[#allocation5 + $0x2]] }
 0x100   : > { %1394 = vrot.lane.b32.xlu1 %v1391_v37, %s2024_s6  ;;  %1392 = vrot.lane.b32.xlu0 %v1389_v48, %s2024_s6  ;;  %v1522_v37 = vrot.slane %v1516_v36, 2  ;;  %v765_v23 = vmul.f32 %v2732_v63, %v764_v14  ;;  %v774_v16 = vrot.slane %v767_v50, 1  ;;  %v1560_v48 = vmul.f32 %v2538_v25, %v1557_v40  ;;  %v1577_v50 = vld [vmem:[%s2136_s25 + $0x1] sm:$0xff] }
 0x101   : > { %v783_v13 = vmul.f32 %v2719_v42, %v781_v60  ;;  %v784_v52 = vmul.f32 %v2741_v51, %v781_v60  ;;  %v782_v31 = vmul.f32 %v2732_v63, %v781_v60  ;;  %v1579_v60 = vmax.f32 %v1577_v50, 0.0 }
 0x102   : > { %v702_v15 = vpop.permute.xlu1 %701  ;;  %v700_v3 = vpop.permute.xlu0 %699  ;;  %v1524_v19 = vsel %vm487_vm1, %v1522_v37, %v1523_v4  ;;  %v775_v24 = vsel %vm309_vm0, %v772_v22, %v774_v16  ;;  %v1567_v56 = vrot.slane %v1560_v48, 2  ;;  %v1578_v4 = vld [vmem:[%s2136_s25 + $0x9] sm:$0xff] }
 0x103   : > { %v706_v7 = vadd.f32 %v702_v15, %v672_v54  ;;  %v705_v2 = vadd.f32 %v700_v3, %v671_v1  ;;  %v1543_v54 = vrot.slane %v1537_v61, 2  ;;  %v1547_v15 = vsel %vm487_vm1, %v1544_v12, %v1546_v45 }
 0x104   : > { %1466 = vrot.lane.b32.xlu1 %v1463_v27, %s2023_s27  ;;  %1464 = vrot.lane.b32.xlu0 %v1461_v5, %s2023_s27  ;;  %v798_v27 = vstv %s2713_s5  ;;  %v771_v5 = vrot.slane %v765_v23, 1  ;;  %v789_v55 = vrot.slane %v783_v13, 1  ;;  %v791_v3 = vrot.slane %v784_v52, 1  ;;  %s190_s5 = scalar_lea.vmem [#allocation7], %s1846_s30 }
 0x105   : > { %v801_v8 = vmul.f32 %v2741_v51, %v798_v27 }
 0x106   : > { %v716_v43 = vpop.permute.xlu1 %715  ;;  %v714_v17 = vpop.permute.xlu0 %713  ;;  %v792_v33 = vsel %vm309_vm0, %v789_v55, %v791_v3 }
 0x107   : > { %v720_v20 = vadd.f32 %v716_v43, %v678_v38  ;;  %v719_v11 = vadd.f32 %v714_v17, %v677_v30  ;;  %v1545_v38 = vsel %vm487_vm1, %v1543_v54, %v1544_v12  ;;  %v788_v43 = vrot.slane %v782_v31, 1  ;;  %v1838_v54 = vld [vmem:[%s2136_s25 + $0x31] sm:$0xff] }
 0x108   : > { %1487 = vrot.lane.b32.xlu1 %v1484_v35, %s2023_s27  ;;  %1485 = vrot.lane.b32.xlu0 %v1482_v59, %s2023_s27  ;;  %v800_v35 = vmul.f32 %v2719_v42, %v798_v27  ;;  %v799_v59 = vmul.f32 %v2732_v63, %v798_v27  ;;  %v808_v34 = vrot.slane %v801_v8, 1  ;;  %v1621_v31 = vmax.f32 %v1838_v54, 0.0 }
 0x10a   : > { %v730_v18 = vpop.permute.xlu1 %729  ;;  %v728_v62 = vpop.permute.xlu0 %727  ;;  %v806_v17 = vrot.slane %v800_v35, 1  ;;  %v805_v37 = vrot.slane %v799_v59, 1 }
 0x10b   : > { %v734_v26 = vadd.f32 %v730_v18, %v692_v6  ;;  %v733_v49 = vadd.f32 %v728_v62, %v691_v29  ;;  %v1559_v6 = vmul.f32 %v2441_v53, %v1557_v40  ;;  %v1558_v29 = vmul.f32 %v2461_v9, %v1557_v40 }
 0x10c   : > { %1508 = vrot.lane.b32.xlu1 %v1505_v44, %s2023_s27  ;;  %1506 = vrot.lane.b32.xlu0 %v1503_v57, %s2023_s27  ;;  %v790_v18 = vsel %vm309_vm0, %v788_v43, %v789_v55  ;;  %v1580_v57 = vmax.f32 %v1578_v4, 0.0  ;;  %v809_v62 = vsel %vm309_vm0, %v806_v17, %v808_v34 }
 0x10d   : > { %v1565_v1 = vrot.slane %v1559_v6, 2  ;;  %v1564_v0 = vrot.slane %v1558_v29, 2  ;;  %v779_v36 = vadd.f32 %v775_v24, %v734_v26  ;;  %v941_v29 = vstv %s2763_s7  ;;  %s1848_s7 = smul.u32 768, %s2069_s16  ;;  %s3004_s16 = scalar_lea.sflag [#allocation3], %s188_s29 }
 0x10e   : > { %v744_v58 = vpop.permute.xlu1 %743  ;;  %v742_v28 = vpop.permute.xlu0 %741  ;;  %v944_v24 = vmul.f32 %v2741_v51, %v941_v29  ;;  %v942_v55 = vmul.f32 %v2732_v63, %v941_v29 }
 0x10f   : > { %v748_v21 = vadd.f32 %v744_v58, %v706_v7  ;;  %v747_v32 = vadd.f32 %v742_v28, %v705_v2  ;;  %v773_v2 = vsel %vm309_vm0, %v771_v5, %v772_v22  ;;  %v1568_v30 = vsel %vm487_vm1, %v1565_v1, %v1567_v56  ;;  %v1833_v22 = vld [vmem:[%s2136_s25 + $0x19] sm:$0xff] }
 0x110   : > { %1529 = vrot.lane.b32.xlu1 %v1526_v46, %s2024_s6  ;;  %1527 = vrot.lane.b32.xlu0 %v1524_v19, %s2024_s6  ;;  %v778_v47 = vadd.f32 %v773_v2, %v733_v49  ;;  %v1566_v44 = vsel %vm487_vm1, %v1564_v0, %v1565_v1  ;;  %v1834_v46 = vld [vmem:[%s2136_s25 + $0x21] sm:$0xff]  ;;  %v807_v49 = vsel %vm309_vm0, %v805_v37, %v806_v17  ;;  %v1839_v58 = vld [vmem:[%s2136_s25 + $0x39] sm:$0xff]  ;;  %v1600_v13 = vmax.f32 %v1833_v22, 0.0 }
 0x111   : > { %v796_v26 = vadd.f32 %v792_v33, %v748_v21  ;;  %v795_v45 = vadd.f32 %v790_v18, %v747_v32  ;;  %v1601_v16 = vmax.f32 %v1834_v46, 0.0  ;;  %v1622_v28 = vmax.f32 %v1839_v58, 0.0 }
 0x112   : > { %v758_v7 = vpop.permute.xlu1 %757  ;;  %v756_v14 = vpop.permute.xlu0 %755  ;;  %v943_v32 = vmul.f32 %v2719_v42, %v941_v29  ;;  %v958_v1 = vstv %s1795_s8  ;;  %v948_v59 = vrot.slane %v942_v55, 2  ;;  %s1654_s8 = sshll.u32 %s190_s5, 4  ;;  %s2998_s8 = int_to_ptr.vmem [resolvable:$true] %s1654_s8 }
 0x113   : > { %v762_v41 = vadd.f32 %v758_v7, %v720_v20  ;;  %v761_v10 = vadd.f32 %v756_v14, %v719_v11  ;;  %v960_v35 = vmul.f32 %v2719_v42, %v958_v1  ;;  %v961_v0 = vmul.f32 %v2741_v51, %v958_v1 }
 0x114   : > { %1550 = vrot.lane.b32.xlu1 %v1547_v15, %s2024_s6  ;;  %1548 = vrot.lane.b32.xlu0 %v1545_v38, %s2024_s6  ;;  %v951_v38 = vrot.slane %v944_v24, 2 }
 0x115   : > { %v813_v48 = vadd.f32 %v809_v62, %v762_v41  ;;  %v812_v21 = vadd.f32 %v807_v49, %v761_v10  ;;  %v949_v41 = vrot.slane %v943_v32, 2  ;;  %v959_v10 = vmul.f32 %v2732_v63, %v958_v1 }
 0x116   : > { %v830_v20 = vpop.permute.xlu1 %829  ;;  %v828_v11 = vpop.permute.xlu0 %827  ;;  %v968_v33 = vrot.slane %v961_v0, 2 }
 0x117   : > { %v834_v39 = vadd.f32 %v830_v20, %v779_v36  ;;  %v833_v40 = vadd.f32 %v828_v11, %v778_v47  ;;  %v952_v20 = vsel %vm487_vm1, %v949_v41, %v951_v38  ;;  %v965_v50 = vrot.slane %v959_v10, 2 }
 0x118   : > { %1571 = vrot.lane.b32.xlu1 %v1568_v30, %s2024_s6  ;;  %1569 = vrot.lane.b32.xlu0 %v1566_v44, %s2024_s6  ;;  %s1796_s6 = sld [smem:[#allocation2 + $0x45]]  ;;  %v966_v30 = vrot.slane %v960_v35, 2  ;;  %v950_v44 = vsel %vm487_vm1, %v948_v59, %v949_v41 }
 0x11a   : > { %v851_v61 = vpop.permute.xlu1 %850  ;;  %v849_v23 = vpop.permute.xlu0 %848 }
 0x11b   : > { %v855_v12 = vadd.f32 %v851_v61, %v796_v26  ;;  %v854_v6 = vadd.f32 %v849_v23, %v795_v45 }
 0x11c   : > { %1589 = vrot.lane.b32.xlu1 %v1580_v57, %s2023_s27  ;;  %1587 = vrot.lane.b32.xlu0 %v1579_v60, %s2023_s27 }
 0x11e   : > { %v872_v19 = vpop.permute.xlu1 %871  ;;  %v870_v27 = vpop.permute.xlu0 %869  ;;  %v975_v2 = vstv %s1796_s6 }
 0x11f   : > { %v876_v52 = vadd.f32 %v872_v19, %v813_v48  ;;  %v875_v15 = vadd.f32 %v870_v27, %v812_v21  ;;  %v977_v17 = vmul.f32 %v2719_v42, %v975_v2  ;;  %v978_v34 = vmul.f32 %v2741_v51, %v975_v2 }
 0x120   : > { %1610 = vrot.lane.b32.xlu1 %v1601_v16, %s2023_s27  ;;  %1608 = vrot.lane.b32.xlu0 %v1600_v13, %s2023_s27  ;;  %v976_v11 = vmul.f32 %v2732_v63, %v975_v2  ;;  %v967_v51 = vsel %vm487_vm1, %v965_v50, %v966_v30  ;;  %v1128_v50 = vstv %s2850_s11  ;;  %s2025_s11 = smov [#allocation7]  }
 0x121   : > { %v983_v26 = vrot.slane %v977_v17, 2  ;;  %v985_v46 = vrot.slane %v978_v34, 2  ;;  %v1122_v17 = vstv %s1806_s10  ;;  %s1951_s10 = scalar_lea.vmem %s2998_s8, 768 }
 0x122   : > { %v893_v5 = vpop.permute.xlu1 %892  ;;  %v891_v7 = vpop.permute.xlu0 %890  ;;  %v982_v62 = vrot.slane %v976_v11, 2  ;;  %p1952_p10 = scmp.ne.s32.totalorder %s2998_s8, %s1951_s10 }
 0x123   : > { %v897_v56 = vadd.f32 %v893_v5, %v834_v39  ;;  %v896_v3 = vadd.f32 %v891_v7, %v833_v40  ;;  %v969_v40 = vsel %vm487_vm1, %v966_v30, %v968_v33  ;;  %v986_v63 = vsel %vm487_vm1, %v983_v26, %v985_v46 }
 0x124   : > { %1631 = vrot.lane.b32.xlu1 %v1622_v28, %s2023_s27  ;;  %1629 = vrot.lane.b32.xlu0 %v1621_v31, %s2023_s27  ;;  %s1815_s27 = sld [smem:[#allocation2 + $0x15]]  ;;  %p1953_p0 = pnand %p1952_p10, %p3062_p12 }
 0x125   : > { %v956_v57 = vadd.f32 %v952_v20, %v897_v56  ;;  %v955_v60 = vadd.f32 %v950_v44, %v896_v3  ;;  %v1241_v20 = vstv %s1816_s9  ;;  %s2996_s9 = scalar_lea.hbm %s3047_s3, %s1848_s7 }
 0x126   : > { %v914_v8 = vpop.permute.xlu1 %913  ;;  %v912_v43 = vpop.permute.xlu0 %911  ;;  %v1243_v11 = vmul.f32 %v2441_v53, %v1241_v20  ;;  %p1954_p7 = pneg %p1953_p0 }
 0x127   : > { %v918_v14 = vadd.f32 %v914_v8, %v855_v12  ;;  %v917_v36 = vadd.f32 %v912_v43, %v854_v6  ;;  %v984_v6 = vsel %vm487_vm1, %v982_v62, %v983_v26  ;;  %v1123_v62 = vmul.f32 %v2461_v9, %v1122_v17 }
 0x129   : > { %v973_v45 = vadd.f32 %v969_v40, %v918_v14  ;;  %v972_v49 = vadd.f32 %v967_v51, %v917_v36  ;;  %v1134_v40 = vstv %s2852_s17  ;;  %v1258_v51 = vstv %s1817_s19  ;;  %s1955_s17 = sshll.u32 %s2025_s11, 4  ;;  %s1956_s17 = int_to_ptr.vmem [resolvable:$false] %s1955_s17 }
 0x12a   : > { %v935_v4 = vpop.permute.xlu1 %934  ;;  %v933_v47 = vpop.permute.xlu0 %932  ;;  %v1224_v30 = vstv %s1815_s27  ;;  %s1957_s19 = scalar_lea.vmem %s1956_s17, 1536  ;;  %p1958_p8 = scmp.lt.s32.totalorder %s2998_s8, %s1956_s17 }
 0x12b   : > { %v939_v39 = vadd.f32 %v935_v4, %v876_v52  ;;  %v938_v18 = vadd.f32 %v933_v47, %v875_v15  ;;  %v1226_v34 = vmul.f32 %v2441_v53, %v1224_v30  ;;  %v1225_v47 = vmul.f32 %v2461_v9, %v1224_v30  ;;  %p1959_p11 = scmp.lt.s32.totalorder %s1957_s19, %s1951_s10 }
 0x12d   : > { %v990_v58 = vadd.f32 %v986_v63, %v939_v39  ;;  %v989_v52 = vadd.f32 %v984_v6, %v938_v18  ;;  %v1227_v39 = vmul.f32 %v2538_v25, %v1224_v30  ;;  %v1244_v18 = vmul.f32 %v2538_v25, %v1241_v20  ;;  %p1960_p13 = por %p1959_p11, %p1958_p8 }
 0x12e   : > { %v1007_v37 = vpop.permute.xlu1 %1006  ;;  %v1005_v42 = vpop.permute.xlu0 %1004 }
 0x12f   : > { %v2793_v61 = vadd.f32 %v1007_v37, %v956_v57  ;;  %v2796_v12 = vadd.f32 %v1005_v42, %v955_v60  ;;  %v2869_v57 = vld [vmem:[%s2136_s25 + $0x38] sm:$0xff]  ;;  %v1232_v60 = vrot.slane %v1226_v34, 1  ;;  %v1234_v42 = vrot.slane %v1227_v39, 1  ;;  %p1961_p1 = pnand %p1960_p13, %p1954_p7 }
 0x130   : > { %v1124_v37 = vmul.f32 %v2869_v57, %v1122_v17  ;;  %v1130_v53 = vmul.f32 %v2869_v57, %v1128_v50  ;;  %v1251_v6 = vrot.slane %v1244_v18, 1 }
 0x132   : > { %v1028_v22 = vpop.permute.xlu1 %1027  ;;  %v1026_v16 = vpop.permute.xlu0 %1025 }
 0x133   : > { %v2799_v23 = vadd.f32 %v1028_v22, %v973_v45  ;;  %v2802_v48 = vadd.f32 %v1026_v16, %v972_v49  ;;  %v1231_v45 = vrot.slane %v1225_v47, 1  ;;  %v1242_v22 = vmul.f32 %v2461_v9, %v1241_v20 }
 0x134   : > { %v1249_v16 = vrot.slane %v1243_v11, 1  ;;  %v1235_v20 = vsel %vm309_vm0, %v1232_v60, %v1234_v42  ;;  %v1418_v42 = vstv %s2875_s24 }
 0x135   : > { %v1233_v17 = vsel %vm309_vm0, %v1231_v45, %v1232_v60  ;;  %v1248_v34 = vrot.slane %v1242_v22, 1 }
 0x136   : > { %v1049_v19 = vpop.permute.xlu1 %1048  ;;  %v1047_v21 = vpop.permute.xlu0 %1046  ;;  %v1252_v18 = vsel %vm309_vm0, %v1249_v16, %v1251_v6 }
 0x137   : > { %v2804_v13 = vadd.f32 %v1049_v19, %v990_v58  ;;  %v2806_v54 = vadd.f32 %v1047_v21, %v989_v52  ;;  %v1401_v58 = vstv %s1824_s20  ;;  %v2885_v19 = vld [vmem:[%s2136_s25 + $0x30] sm:$0xff]  ;;  %v1136_v52 = vmul.f32 %v2869_v57, %v1134_v40 }
 0x138   : > { %v2890_v21 = vmul.f32 %v2869_v57, %v1258_v51  ;;  %v2901_v39 = vmul.f32 %v2869_v57, %v1401_v58  ;;  %v1404_v47 = vmul.f32 %v2538_v25, %v1401_v58 }
 0x13a   : > { %v1070_v29 = vpop.permute.xlu1 %1069  ;;  %v1068_v27 = vpop.permute.xlu0 %1067 }
 0x13b   : > { %v1074_v46 = vadd.f32 %v1070_v29, %v2793_v61  ;;  %v1073_v49 = vadd.f32 %v1068_v27, %v2796_v12  ;;  %v1129_v61 = vmul.f32 %v2885_v19, %v1128_v50  ;;  %v1261_v29 = vmul.f32 %v2538_v25, %v1258_v51 }
 0x13c   : > { %v1135_v27 = vmul.f32 %v2885_v19, %v1134_v40 }
 0x13d   : > { %v1126_v12 = vadd.f32 %v1124_v37, %v1074_v46  ;;  %v1125_v11 = vadd.f32 %v1123_v62, %v1073_v49  ;;  %v1266_v37 = vrot.slane %v2890_v21, 1  ;;  %v1268_v40 = vrot.slane %v1261_v29, 1 }
 0x13e   : > { %v2808_v28 = vpop.permute.xlu1 %1090  ;;  %v2810_v15 = vpop.permute.xlu0 %1088  ;;  %v1259_v46 = vmul.f32 %v2885_v19, %v1258_v51  ;;  %v1411_v62 = vrot.slane %v1404_v47, 2  ;;  %v1402_v49 = vmul.f32 %v2885_v19, %v1401_v58 }
 0x13f   : > { %v1095_v9 = vadd.f32 %v2808_v28, %v2799_v23  ;;  %v1094_v23 = vadd.f32 %v2810_v15, %v2802_v48 }
 0x141   : > { %v1131_v21 = vadd.f32 %v1129_v61, %v1094_v23 }
 0x142   : > { %v2812_v5 = vpop.permute.xlu1 %1111  ;;  %v2814_v31 = vpop.permute.xlu0 %1109 }
 0x143   : > { %v1116_v45 = vadd.f32 %v2812_v5, %v2804_v13  ;;  %v1115_v15 = vadd.f32 %v2814_v31, %v2806_v54  ;;  %v1250_v5 = vsel %vm309_vm0, %v1248_v34, %v1249_v16  ;;  %v1420_v54 = vmul.f32 %v2869_v57, %v1418_v42 }
 0x144   : > { %v1421_v31 = vmul.f32 %v2538_v25, %v1418_v42  ;;  %v1435_v16 = vstv %s2906_s26 }
 0x145   : > { %v1138_v29 = vadd.f32 %v1136_v52, %v1116_v45  ;;  %v1137_v61 = vadd.f32 %v1135_v27, %v1115_v15  ;;  %v1426_v52 = vrot.slane %v1420_v54, 2  ;;  %v1419_v27 = vmul.f32 %v2885_v19, %v1418_v42 }
 0x146   : > { %v2816_v32 = vpop.permute.xlu1 %1147  ;;  %v2818_v24 = vpop.permute.xlu0 %1145 }
 0x147   : > { %v1152_v28 = vadd.f32 %v2816_v32, %v1126_v12  ;;  %v1151_v22 = vadd.f32 %v2818_v24, %v1125_v11  ;;  %v1409_v32 = vrot.slane %v2901_v39, 2  ;;  %v1269_v24 = vsel %vm309_vm0, %v1266_v37, %v1268_v40 }
 0x14a   : > { %v2820_v1 = vpop.permute.xlu1 %1161  ;;  %v2822_v56 = vpop.permute.xlu0 %1159 }
 0x14b   : > { %v1165_v58 = vadd.f32 %v2822_v56, %v1131_v21 }
 0x14e   : > { %v2824_v7 = vpop.permute.xlu1 %1175  ;;  %v2826_v55 = vpop.permute.xlu0 %1173 }
 0x14f   : > { %v1180_v34 = vadd.f32 %v2824_v7, %v1138_v29  ;;  %v1179_v56 = vadd.f32 %v2826_v55, %v1137_v61  ;;  %v1436_v55 = vmul.f32 %v2885_v19, %v1435_v16 }
 0x152   : > { %v2828_v3 = vpop.permute.xlu1 %1189  ;;  %v2830_v35 = vpop.permute.xlu0 %1187 }
 0x153   : > { %v1194_v48 = vadd.f32 %v2828_v3, %v1152_v28  ;;  %v1193_v13 = vadd.f32 %v2830_v35, %v1151_v22  ;;  %v1265_v3 = vrot.slane %v1259_v46, 1  ;;  %v1412_v35 = vsel %vm487_vm1, %v1409_v32, %v1411_v62 }
 0x155   : > { %v1238_v47 = vadd.f32 %v1233_v17, %v1193_v13  ;;  %v1920_v17 = vld [vmem:[%s2136_s25 + $0x40] sm:$0x3]  ;;  %s2964_s25 = sld [smem:[#allocation5 + $0x1]] }
 0x156   : > { %v2832_v8 = vpop.permute.xlu1 %1203  ;;  %v2834_v41 = vpop.permute.xlu0 %1201  ;;  %v1438_v40 = vmul.f32 %v1920_v17, %v1435_v16 }
 0x157   : > { %v1207_v25 = vadd.f32 %v2834_v41, %v1165_v58 }
 0x159   : > { %v1255_v45 = vadd.f32 %v1250_v5, %v1207_v25 }
 0x15a   : > { %v2836_v38 = vpop.permute.xlu1 %1217  ;;  %v2838_v0 = vpop.permute.xlu0 %1215 }
 0x15b   : > { %v1222_v23 = vadd.f32 %v2836_v38, %v1180_v34  ;;  %v1221_v41 = vadd.f32 %v2838_v0, %v1179_v56  ;;  %v1267_v38 = vsel %vm309_vm0, %v1265_v3, %v1266_v37 }
 0x15d   : > { %v1273_v19 = vadd.f32 %v1269_v24, %v1222_v23  ;;  %v1272_v62 = vadd.f32 %v1267_v38, %v1221_v41 }
 0x15e   : > { %v2840_v14 = vpop.permute.xlu1 %1289  ;;  %v2842_v2 = vpop.permute.xlu0 %1287 }
 0x15f   : > { %v1293_v28 = vadd.f32 %v2842_v2, %v1238_v47 }
 0x162   : > { %v2844_v43 = vpop.permute.xlu1 %1310  ;;  %v2846_v59 = vpop.permute.xlu0 %1308 }
 0x163   : > { %v1314_v22 = vadd.f32 %v2846_v59, %v1255_v45 }
 0x166   : > { %v2848_v10 = vpop.permute.xlu1 %1331  ;;  %v2854_v36 = vpop.permute.xlu0 %1329 }
 0x16a   : > { %v2856_v4 = vpop.permute.xlu1 %1352  ;;  %v2858_v33 = vpop.permute.xlu0 %1350 }
 0x16b   : > { %v1356_v2 = vadd.f32 %v2858_v33, %v1293_v28  ;;  %v1336_v33 = vadd.f32 %v2848_v10, %v1273_v19 }
 0x16e   : > { %v2863_v44 = vpop.permute.xlu1 %1373  ;;  %v2873_v26 = vpop.permute.xlu0 %1371 }
 0x172   : > { %v2881_v63 = vpop.permute.xlu1 %1394  ;;  %v2893_v30 = vpop.permute.xlu0 %1392 }
 0x173   : > { %3060 = vst [vmem:[#allocation11_spill] sm:$0xff] %v2893_v30  ;;  %v1132_v30 = vadd.f32 %v1130_v53, %v1095_v9  ;;  %v1408_v9 = vrot.slane %v1402_v49, 2  ;;  %v1445_v49 = vrot.slane %v1438_v40, 2  ;;  %v1399_v24 = vadd.f32 %v2881_v63, %v1336_v33 }
 0x175   : > { %v1166_v6 = vadd.f32 %v2820_v1, %v1132_v30  ;;  %v1239_v30 = vadd.f32 %v1235_v20, %v1194_v48 }
 0x176   : > { %v2904_v50 = vpop.permute.xlu1 %1466  ;;  %v2914_v60 = vpop.permute.xlu0 %1464 }
 0x177   : > { %v1208_v1 = vadd.f32 %v2832_v8, %v1166_v6  ;;  %v1294_v39 = vadd.f32 %v2840_v14, %v1239_v30  ;;  %v1428_v8 = vrot.slane %v1421_v31, 2  ;;  %v1437_v14 = vmul.f32 %v2869_v57, %v1435_v16 }
 0x178   : > { %v1442_v6 = vrot.slane %v1436_v55, 2 }
 0x179   : > { %v1256_v11 = vadd.f32 %v1252_v18, %v1208_v1  ;;  %v1357_v7 = vadd.f32 %v2856_v4, %v1294_v39  ;;  %v1410_v4 = vsel %vm487_vm1, %v1408_v9, %v1409_v32  ;;  %v1429_v0 = vsel %vm487_vm1, %v1426_v52, %v1428_v8 }
 0x17a   : > { %v2925_v51 = vpop.permute.xlu1 %1487  ;;  %v2933_v53 = vpop.permute.xlu0 %1485  ;;  %v1425_v18 = vrot.slane %v1419_v27, 2  ;;  %v1377_v32 = vadd.f32 %v2873_v26, %v1314_v22  ;;  %v1415_v59 = vadd.f32 %v1410_v4, %v1356_v2  ;;  %v3061_v58 = vld [vmem:[#allocation11_spill] sm:$0xff]  ;;  %v1603_v39 = vstv %s2964_s25 }
 0x17b   : > { %v1315_v42 = vadd.f32 %v2844_v43, %v1256_v11  ;;  %v1416_v15 = vadd.f32 %v1412_v35, %v1357_v7  ;;  %v1443_v43 = vrot.slane %v1437_v14, 2  ;;  %v1624_v7 = vstv %s2979_s4 }
 0x17c   : > { %v1427_v13 = vsel %vm487_vm1, %v1425_v18, %v1426_v52  ;;  %v1470_v3 = vadd.f32 %v2914_v60, %v1415_v59 }
 0x17d   : > { %v1378_v48 = vadd.f32 %v2863_v44, %v1315_v42  ;;  %v1471_v21 = vadd.f32 %v2904_v50, %v1416_v15  ;;  %v1335_v44 = vadd.f32 %v2854_v36, %v1272_v62  ;;  %v1446_v29 = vsel %vm487_vm1, %v1443_v43, %v1445_v49 }
 0x17e   : > { %v2939_v12 = vpop.permute.xlu1 %1508  ;;  %v2946_v20 = vpop.permute.xlu0 %1506  ;;  %v1582_v50 = vstv %s2955_s28  ;;  %v1432_v1 = vadd.f32 %v1427_v13, %v1377_v32  ;;  %v1444_v63 = vsel %vm487_vm1, %v1442_v6, %v1443_v43  ;;  %v1450_v35 = vadd.f32 %v1446_v29, %v1399_v24 }
 0x17f   : > { %v1433_v54 = vadd.f32 %v1429_v0, %v1378_v48  ;;  %v1398_v10 = vadd.f32 %v3061_v58, %v1335_v44 }
 0x180   : > { %v1491_v61 = vadd.f32 %v2933_v53, %v1432_v1  ;;  %v1513_v47 = vadd.f32 %v2939_v12, %v1450_v35 }
 0x181   : > { %v1492_v36 = vadd.f32 %v2925_v51, %v1433_v54  ;;  %v1449_v34 = vadd.f32 %v1444_v63, %v1398_v10 }
 0x182   : > { %v1530_v46 = vpop.permute.xlu1 %1529  ;;  %v1528_v57 = vpop.permute.xlu0 %1527 }
 0x183   : > { %v1534_v31 = vadd.f32 %v1530_v46, %v1471_v21  ;;  %v1533_v30 = vadd.f32 %v1528_v57, %v1470_v3  ;;  %v1512_v27 = vadd.f32 %v2946_v20, %v1449_v34 }
 0x185   : > { %v1584_v16 = vadd.f32 %v1582_v50, %v1534_v31  ;;  %v1583_v51 = vadd.f32 %v1582_v50, %v1533_v30 }
 0x186   : > { %v1551_v37 = vpop.permute.xlu1 %1550  ;;  %v1549_v5 = vpop.permute.xlu0 %1548 }
 0x187   : > { %v1555_v9 = vadd.f32 %v1551_v37, %v1492_v36  ;;  %v1554_v56 = vadd.f32 %v1549_v5, %v1491_v61 }
 0x189   : > { %v1605_v28 = vadd.f32 %v1603_v39, %v1555_v9  ;;  %v1604_v12 = vadd.f32 %v1603_v39, %v1554_v56 }
 0x18a   : > { %v1572_v26 = vpop.permute.xlu1 %1571  ;;  %v1570_v60 = vpop.permute.xlu0 %1569 }
 0x18b   : > { %v1576_v23 = vadd.f32 %v1572_v26, %v1513_v47  ;;  %v1575_v41 = vadd.f32 %v1570_v60, %v1512_v27 }
 0x18d   : > { %v1626_v40 = vadd.f32 %v1624_v7, %v1576_v23  ;;  %v1625_v42 = vadd.f32 %v1624_v7, %v1575_v41 }
 0x18e   : > { %v1590_v25 = vpop.permute.xlu1 %1589  ;;  %v1588_v8 = vpop.permute.xlu0 %1587 }
 0x18f   : > { %v1594_v52 = vadd.f32 %v1590_v25, %v1584_v16  ;;  %v1593_v53 = vadd.f32 %v1588_v8, %v1583_v51 }
 0x191   : > { %1597 = vst.msk [vmem:[%s190_s5 + $0x8] sm:$0xff] %vm1595_vm2, %v1594_v52  ;;  %1596 = vst.msk [vmem:[%s190_s5] sm:$0xff] %vm1595_vm2, %v1593_v53 }
 0x192   : > { %v1611_v11 = vpop.permute.xlu1 %1610  ;;  %v1609_v17 = vpop.permute.xlu0 %1608 }
 0x193   : > { %v1615_v14 = vadd.f32 %v1611_v11, %v1605_v28  ;;  %v1614_v20 = vadd.f32 %v1609_v17, %v1604_v12 }
 0x195   : > { %1837 = vst.msk [vmem:[%s190_s5 + $0x18] sm:$0xff] %vm1595_vm2, %v1615_v14  ;;  %1836 = vst.msk [vmem:[%s190_s5 + $0x10] sm:$0xff] %vm1595_vm2, %v1614_v20 }
 0x196   : > { %v1632_v55 = vpop.permute.xlu1 %1631  ;;  %v1630_v45 = vpop.permute.xlu0 %1629 }
 0x197   : > { %v1636_v46 = vadd.f32 %v1632_v55, %v1626_v40  ;;  %v1635_v38 = vadd.f32 %v1630_v45, %v1625_v42 }
 0x199   : > { %1842 = vst.msk [vmem:[%s190_s5 + $0x28] sm:$0xff] %vm1595_vm2, %v1636_v46  ;;  %1841 = vst.msk [vmem:[%s190_s5 + $0x20] sm:$0xff] %vm1595_vm2, %v1635_v38 }
 0x19a   : > { %1964 = shalt.err (!%p1961_p1)
}
 0x19b   : > { %s1965_s20 = scalar_lea.hbm %s2996_s9, 768  ;;  %s1969_s28 = scalar_lea.hbm %s3047_s3, 1536 }
 0x19c   : > { %p1966_p2 = scmp.ne.s32.totalorder %s2996_s9, %s1965_s20  ;;  %p1970_p9 = scmp.lt.s32.totalorder %s2996_s9, %s3047_s3 }
 0x19d   : > { %p1971_p5 = scmp.lt.s32.totalorder %s1969_s28, %s1965_s20 }
 0x19e   : > { %p1967_p3 = pnand %p1966_p2, %p3062_p12 }
 0x19f   : > { %p1972_p6 = por %p1971_p5, %p1970_p9 }
 0x1a0   : > { %p1968_p4 = pneg %p1967_p3 }
 0x1a2   : > { %p1973_p10 = pnand %p1972_p6, %p1968_p4 }
 0x1a4   : > { %1976 = shalt.err (!%p1973_p10)
}
 0x1a5   : > { %s2026_s30 = smov 128   ;;  %s2027_s4 = smov 8  }
 0x1a6   : > { %1857 = dma.vmem_to_hbm [thread:$0]  (%p3062_p12), %s2998_s8, 768, %s2996_s9, %s3004_s16, %s2026_s30, %s2026_s30, %s2027_s4  }
 0x1a7 PF: > { %p1874_p0 = scmp.ge.s32.totalorder %s2019_s15, 2  ;;  %s1669_s5 = sand.u32 1, %s2007_s12  }
 0x1a8   : > { %p3063_p7 = scmp.ne.s32.totalorder %s3052_s23, 0  ;;  %s1670_s7 = scalar_lea.sflag [#allocation3], %s1669_s5 }
 0x1aa   : > { %p1867_p8 = pnand %p1874_p0, %p3063_p7 }
 0x1ac   : > { %p1868_p11 = pneg %p1867_p8 }
 0x1ae   : > { %2002 = dma.done.wait (%p1868_p11), %s1670_s7, 768  }
 0x1af   : > { %2004 = vsyncadd (%p1868_p11), %s1670_s7, 4294966528  ;;  %p15_p13 = scmp.ge.s32.totalorder %s2073_s18, 4   ;;  %s3064_s12 = smov %s2011_s13 }
 0x1b0   : > { %s3065_s13 = smov %s2015_s14  ;;  %s3066_s14 = smov %s2084_s21 }
 0x1b1   : > { %s3067_s15 = smov %s2073_s18  ;;  %17 = sbr.rel (!%p15_p13) target bundleno = 5 (0x5), region = 80 }
 0x1b6   :  { %1675 = vsyncpa [#allocation3], 1 }
 0x1b7   :  { %1677 = vsyncpa [#allocation3 + $0x1], 1 }
 0x1b8   :  { %1678 = vsyncpa [#allocation4], 1 }
 0x1b9   :  { %1680 = vsyncpa [#allocation4 + $0x1], 1 }
 0x1ba   :  { %1681 = vsyncpa [#allocation6], 1 }

</bundles_post_ra>
